<compile_context>
chip_gen: v7x
topology: tpu7x:2x2x1
jax: 0.10.0
libtpu: 0.0.40
codegen_flags: <defaults>
</compile_context>

<pallas_src>
import functools

import numpy as np
import jax
import jax.numpy as jnp
from jax.experimental import pallas as pl
from jax.experimental.pallas import tpu as pltpu

SELU_ALPHA = 1.6732632423543772
SELU_SCALE = 1.0507009873554805
BN_EPS = 1e-5
SQUASH_EPS = 1e-8


def _selu(x):
    return SELU_SCALE * jnp.where(x > 0, x, SELU_ALPHA * (jnp.exp(x) - 1.0))


def primary_capsule_kernel(x_ref, w12_ref, w1b_ref, b12_ref, b1_ref, s3_ref,
                           b3_ref, o_ref, *, num_caps, cap_dim):
    """One (channels x voxel-tile) slab through the residual block + squash."""
    c_out = num_caps * cap_dim

    # bf16 MXU inputs, f32 accumulation.
    x = x_ref[...].astype(jnp.bfloat16)                       # (C_in, TV)

    # Fused: road1 conv-a and road2 conv share the C_in contraction.
    # BN scales are already folded into the weight rows; only bias adds remain.
    h12 = jnp.dot(w12_ref[...], x,
                  preferred_element_type=jnp.float32)         # (2*C_out, TV)
    h1 = _selu(h12[:c_out, :] + b12_ref[:c_out, :])           # road1 after conv-a
    h2 = _selu(h12[c_out:, :] + b12_ref[c_out:, :])           # road2

    # road1 conv-b (BN scale folded into weights).
    h1 = jnp.dot(w1b_ref[...], h1.astype(jnp.bfloat16),
                 preferred_element_type=jnp.float32)          # (C_out, TV)
    h1 = _selu(h1 + b1_ref[...])

    # road3: BN -> SELU on the residual sum (scale cannot be folded upstream).
    r = _selu((h1 + h2) * s3_ref[...] + b3_ref[...])          # (C_out, TV) f32

    # Squash along capsule_dim: per-capsule sublane-block reduce + lane
    # broadcast.  Rows [c*cap_dim, (c+1)*cap_dim) belong to capsule c, so the
    # reduction is over contiguous, tile-aligned sublane rows (no matmul, no
    # transpose).  If cap_dim is a multiple of 8 (f32 sublane count) each
    # capsule is stored directly into its sublane-aligned row slice of o_ref;
    # otherwise fall back to a single concatenated store.
    r2 = r * r
    aligned = (cap_dim % 8 == 0)
    blocks = []
    for c in range(num_caps):
        lo = c * cap_dim
        n2 = jnp.sum(r2[lo:lo + cap_dim, :], axis=0, keepdims=True)  # (1, TV)
        scale = (n2 / (1.0 + n2)) * jax.lax.rsqrt(n2 + SQUASH_EPS)
        blk = (r[lo:lo + cap_dim, :] * scale).astype(o_ref.dtype)
        if aligned:
            o_ref[lo:lo + cap_dim, :] = blk
        else:
            blocks.append(blk)
    if not aligned:
        o_ref[...] = jnp.concatenate(blocks, axis=0)


def _pick_tile_v(v_total, cap=2048):
    """Largest lane-aligned divisor of the per-batch voxel count (<= cap)."""
    best = 128
    t = 128
    while t <= min(v_total, cap):
        if v_total % t == 0:
            best = t
        t += 128
    return best


def primary_capsule_forward(x, prep_params, *, num_caps, cap_dim, tile_v=None):
    """x: (N, C_in, A, B, G) NCDHW -> (N, num_caps, cap_dim, A, B, G)."""
    w12, w1b, b12, b1, s3, b3 = prep_params
    N, C_in, da, db, dg = x.shape
    V = da * db * dg
    C_out = num_caps * cap_dim
    assert V % 128 == 0, "per-batch voxel count must be lane-aligned (x128)"
    if tile_v is None:
        # One or a few big tiles per batch; grid = (N, V//tile_v) keeps >=2
        # parallel steps so both v7x TensorCores get work.  VMEM use per step
        # (<< 1 MiB here) is far under the 32 MiB scoped limit set below.
        tile_v = _pick_tile_v(V)
    assert V % tile_v == 0 and tile_v % 128 == 0

    # NCDHW already has voxels last: channel-major slab is a pure reshape.
    xf = x.reshape(N * C_in, V).astype(jnp.float32)

    grid = (N, V // tile_v)
    T = N * V
    flops = int(T * (2 * C_in * (2 * C_out) + 2 * C_out * C_out + 14 * C_out))
    transcendentals = int(T * (4 * C_out + num_caps))
    bytes_accessed = int(xf.size * 4 + N * C_out * V * 4
                         + (w12.size + w1b.size) * 2
                         + (b12.size + b1.size + s3.size + b3.size) * 4)

    kernel = functools.partial(primary_capsule_kernel,
                               num_caps=num_caps, cap_dim=cap_dim)

    out = pl.pallas_call(
        kernel,
        out_shape=jax.ShapeDtypeStruct((N * C_out, V), jnp.float32),
        grid=grid,
        in_specs=[
            pl.BlockSpec((C_in, tile_v), lambda n, v: (n, v)),       # x slab
            pl.BlockSpec((2 * C_out, C_in), lambda n, v: (0, 0)),    # fused W (BN-folded)
            pl.BlockSpec((C_out, C_out), lambda n, v: (0, 0)),       # road1 conv-b W
            pl.BlockSpec((2 * C_out, 1), lambda n, v: (0, 0)),       # fused biases
            pl.BlockSpec((C_out, 1), lambda n, v: (0, 0)),           # road1-b bias
            pl.BlockSpec((C_out, 1), lambda n, v: (0, 0)),           # BN3 scale
            pl.BlockSpec((C_out, 1), lambda n, v: (0, 0)),           # BN3 bias
        ],
        out_specs=pl.BlockSpec((C_out, tile_v), lambda n, v: (n, v)),
        compiler_params=pltpu.CompilerParams(
            dimension_semantics=("parallel", "parallel"),
            vmem_limit_bytes=32 * 1024 * 1024),
        cost_estimate=pl.CostEstimate(
            flops=flops, transcendentals=transcendentals,
            bytes_accessed=bytes_accessed),
    )(xf, w12, w1b, b12, b1, s3, b3)

    # (N*C_out, V) -> capsule layout: pure reshape, no transpose.
    return out.reshape(N, num_caps, cap_dim, da, db, dg)


def init_params(key, c_in, c_out):
    """Raw (PyTorch-layout) parameters."""
    k1, k2, k3, k4, k5 = jax.random.split(key, 5)
    w1a = jax.random.normal(k1, (c_in, c_out), jnp.float32) / np.sqrt(c_in)
    w1b = jax.random.normal(k2, (c_out, c_out), jnp.float32) / np.sqrt(c_out)
    w2 = jax.random.normal(k3, (c_in, c_out), jnp.float32) / np.sqrt(c_in)
    gamma = 1.0 + 0.1 * jax.random.normal(k4, (4, c_out), jnp.float32)
    beta = 0.1 * jax.random.normal(k5, (4, c_out), jnp.float32)
    # Eval-mode BatchNorm3d with fresh running stats (mean=0, var=1), folded.
    bn_scale = gamma / np.sqrt(1.0 + BN_EPS)
    bn_bias = beta
    return w1a, w1b, w2, bn_scale, bn_bias


def prepare_params(raw_params):
    """Fold BN scales into channel-major (C_out, C_in) weights; cast to bf16."""
    w1a, w1b, w2, bn_s, bn_b = raw_params
    w1a_f = bn_s[0][:, None] * w1a.T                     # (C_out, C_in)
    w2_f = bn_s[2][:, None] * w2.T                       # (C_out, C_in)
    w12 = jnp.concatenate([w1a_f, w2_f], axis=0).astype(jnp.bfloat16)
    w1b_f = (bn_s[1][:, None] * w1b.T).astype(jnp.bfloat16)  # (C_out, C_out)
    b12 = jnp.concatenate([bn_b[0], bn_b[2]])[:, None].astype(jnp.float32)
    b1 = bn_b[1][:, None].astype(jnp.float32)
    s3 = bn_s[3][:, None].astype(jnp.float32)
    b3 = bn_b[3][:, None].astype(jnp.float32)
    return w12, w1b_f, b12, b1, s3, b3


def reference_forward(x, prep_params, num_caps, cap_dim):
    """Pure-JAX reference of the same math (mirrors the bf16 MXU-input casts)."""
    w12, w1b, b12, b1, s3, b3 = prep_params
    N, C_in, da, db, dg = x.shape
    V = da * db * dg
    c_out = num_caps * cap_dim
    xc = x.reshape(N, C_in, V).astype(jnp.bfloat16).astype(jnp.float32)
    w12f = w12.astype(jnp.float32)
    w1bf = w1b.astype(jnp.float32)

    h12 = jnp.einsum('oc,ncv->nov', w12f, xc)                    # (N, 2C_out, V)
    h1 = _selu(h12[:, :c_out, :] + b12[:c_out][None])
    h2 = _selu(h12[:, c_out:, :] + b12[c_out:][None])
    h1 = h1.astype(jnp.bfloat16).astype(jnp.float32)
    h1 = _selu(jnp.einsum('oc,ncv->nov', w1bf, h1) + b1[None])
    r = _selu((h1 + h2) * s3[None] + b3[None])                   # (N, C_out, V)

    r = r.reshape(N, num_caps, cap_dim, da, db, dg)
    n2 = jnp.sum(r * r, axis=2, keepdims=True)
    return (n2 / (1.0 + n2)) * r * jax.lax.rsqrt(n2 + SQUASH_EPS)


if __name__ == "__main__":
    # Small, module-consistent shapes: N=2, in_features=8,
    # num_out_capsules=4, capsule_dim=8, b_in=b_out=4 -> spatial 8x8x8.
    N, C_IN = 2, 8
    NUM_CAPS, CAP_DIM = 4, 8
    B_OUT = 4
    D = 2 * B_OUT
    C_OUT = NUM_CAPS * CAP_DIM

    key = jax.random.PRNGKey(0)
    kx, kp = jax.random.split(key)
    x = jax.random.normal(kx, (N, C_IN, D, D, D), jnp.float32)
    raw = init_params(kp, C_IN, C_OUT)
    prep = prepare_params(raw)

    y = primary_capsule_forward(x, prep, num_caps=NUM_CAPS, cap_dim=CAP_DIM)
    y = jax.block_until_ready(y)

    y_ref = reference_forward(x, prep, NUM_CAPS, CAP_DIM)
    assert y.shape == (N, NUM_CAPS, CAP_DIM, D, D, D)
    np.testing.assert_allclose(np.asarray(y), np.asarray(y_ref),
                               rtol=5e-3, atol=5e-3)
    print("KERNEL_OK")
</pallas_src>

<mosaic_0001>
module attributes {stable_mosaic.version = 11 : i64} {
  func.func @primary_capsule_kernel(%arg0: i32, %arg1: i32, %arg2: memref<8x512xf32, #tpu.memory_space<vmem>>, %arg3: memref<64x8xbf16, #tpu.memory_space<vmem>>, %arg4: memref<32x32xbf16, #tpu.memory_space<vmem>>, %arg5: memref<64x1xf32, #tpu.memory_space<vmem>>, %arg6: memref<32x1xf32, #tpu.memory_space<vmem>>, %arg7: memref<32x1xf32, #tpu.memory_space<vmem>>, %arg8: memref<32x1xf32, #tpu.memory_space<vmem>>, %arg9: memref<32x512xf32, #tpu.memory_space<vmem>>) attributes {dimension_semantics = [#tpu.dimension_semantics<parallel>, #tpu.dimension_semantics<parallel>], iteration_bounds = array<i64: 2, 1>, scalar_prefetch = 0 : i64, scratch_operands = 0 : i64, tpu.core_type = #tpu.core_type<tc>, window_params = [{transform_indices = @transform_0, window_bounds = array<i64: 8, 512>}, {pipeline_mode = #tpu.pipeline_mode<synchronous>, transform_indices = @transform_1, window_bounds = array<i64: 64, 8>}, {pipeline_mode = #tpu.pipeline_mode<synchronous>, transform_indices = @transform_2, window_bounds = array<i64: 32, 32>}, {pipeline_mode = #tpu.pipeline_mode<synchronous>, transform_indices = @transform_3, window_bounds = array<i64: 64, 1>}, {pipeline_mode = #tpu.pipeline_mode<synchronous>, transform_indices = @transform_4, window_bounds = array<i64: 32, 1>}, {pipeline_mode = #tpu.pipeline_mode<synchronous>, transform_indices = @transform_5, window_bounds = array<i64: 32, 1>}, {pipeline_mode = #tpu.pipeline_mode<synchronous>, transform_indices = @transform_6, window_bounds = array<i64: 32, 1>}, {transform_indices = @transform_7, window_bounds = array<i64: 32, 512>}]} {
    %c0 = arith.constant 0 : index
    %c0_0 = arith.constant 0 : index
    %0 = vector.load %arg2[%c0, %c0_0] : memref<8x512xf32, #tpu.memory_space<vmem>>, vector<8x512xf32>
    %1 = arith.truncf %0 : vector<8x512xf32> to vector<8x512xbf16>
    %c0_1 = arith.constant 0 : index
    %c0_2 = arith.constant 0 : index
    %2 = vector.load %arg3[%c0_1, %c0_2] : memref<64x8xbf16, #tpu.memory_space<vmem>>, vector<64x8xbf16>
    %cst = arith.constant dense<0.000000e+00> : vector<64x512xf32>
    %3 = tpu.matmul %2, %1, %cst {dimension_numbers = #tpu.dot_dimension_numbers<[1], [0], [0], [1], [0, 0, 1, 1], [], []>} : vector<64x8xbf16>, vector<8x512xbf16>, vector<64x512xf32> -> vector<64x512xf32>
    %4 = vector.extract_strided_slice %3 {offsets = [0, 0], sizes = [32, 512], strides = [1, 1]} : vector<64x512xf32> to vector<32x512xf32>
    %c0_3 = arith.constant 0 : index
    %c0_4 = arith.constant 0 : index
    %5 = vector.load %arg5[%c0_3, %c0_4] : memref<64x1xf32, #tpu.memory_space<vmem>>, vector<32x1xf32>
    %6 = vector.broadcast %5 : vector<32x1xf32> to vector<32x512xf32>
    %7 = arith.addf %4, %6 : vector<32x512xf32>
    %cst_5 = arith.constant 0.000000e+00 : f32
    %8 = vector.broadcast %cst_5 : f32 to vector<32x512xf32>
    %9 = arith.cmpf ogt, %7, %8 : vector<32x512xf32>
    %10 = math.exp %7 : vector<32x512xf32>
    %cst_6 = arith.constant 1.000000e+00 : f32
    %11 = vector.broadcast %cst_6 : f32 to vector<32x512xf32>
    %12 = arith.subf %10, %11 : vector<32x512xf32>
    %cst_7 = arith.constant 1.67326319 : f32
    %13 = vector.broadcast %cst_7 : f32 to vector<32x512xf32>
    %14 = arith.mulf %13, %12 : vector<32x512xf32>
    %15 = arith.select %9, %7, %14 : vector<32x512xi1>, vector<32x512xf32>
    %cst_8 = arith.constant 1.05070102 : f32
    %16 = vector.broadcast %cst_8 : f32 to vector<32x512xf32>
    %17 = arith.mulf %16, %15 : vector<32x512xf32>
    %18 = vector.extract_strided_slice %3 {offsets = [32, 0], sizes = [32, 512], strides = [1, 1]} : vector<64x512xf32> to vector<32x512xf32>
    %c32 = arith.constant 32 : index
    %c0_9 = arith.constant 0 : index
    %19 = vector.load %arg5[%c32, %c0_9] : memref<64x1xf32, #tpu.memory_space<vmem>>, vector<32x1xf32>
    %20 = vector.broadcast %19 : vector<32x1xf32> to vector<32x512xf32>
    %21 = arith.addf %18, %20 : vector<32x512xf32>
    %cst_10 = arith.constant 0.000000e+00 : f32
    %22 = vector.broadcast %cst_10 : f32 to vector<32x512xf32>
    %23 = arith.cmpf ogt, %21, %22 : vector<32x512xf32>
    %24 = math.exp %21 : vector<32x512xf32>
    %cst_11 = arith.constant 1.000000e+00 : f32
    %25 = vector.broadcast %cst_11 : f32 to vector<32x512xf32>
    %26 = arith.subf %24, %25 : vector<32x512xf32>
    %cst_12 = arith.constant 1.67326319 : f32
    %27 = vector.broadcast %cst_12 : f32 to vector<32x512xf32>
    %28 = arith.mulf %27, %26 : vector<32x512xf32>
    %29 = arith.select %23, %21, %28 : vector<32x512xi1>, vector<32x512xf32>
    %cst_13 = arith.constant 1.05070102 : f32
    %30 = vector.broadcast %cst_13 : f32 to vector<32x512xf32>
    %31 = arith.mulf %30, %29 : vector<32x512xf32>
    %c0_14 = arith.constant 0 : index
    %c0_15 = arith.constant 0 : index
    %32 = vector.load %arg4[%c0_14, %c0_15] : memref<32x32xbf16, #tpu.memory_space<vmem>>, vector<32x32xbf16>
    %33 = arith.truncf %17 : vector<32x512xf32> to vector<32x512xbf16>
    %cst_16 = arith.constant dense<0.000000e+00> : vector<32x512xf32>
    %34 = tpu.matmul %32, %33, %cst_16 {dimension_numbers = #tpu.dot_dimension_numbers<[1], [0], [0], [1], [0, 0, 1, 1], [], []>} : vector<32x32xbf16>, vector<32x512xbf16>, vector<32x512xf32> -> vector<32x512xf32>
    %c0_17 = arith.constant 0 : index
    %c0_18 = arith.constant 0 : index
    %35 = vector.load %arg6[%c0_17, %c0_18] : memref<32x1xf32, #tpu.memory_space<vmem>>, vector<32x1xf32>
    %36 = vector.broadcast %35 : vector<32x1xf32> to vector<32x512xf32>
    %37 = arith.addf %34, %36 : vector<32x512xf32>
    %cst_19 = arith.constant 0.000000e+00 : f32
    %38 = vector.broadcast %cst_19 : f32 to vector<32x512xf32>
    %39 = arith.cmpf ogt, %37, %38 : vector<32x512xf32>
    %40 = math.exp %37 : vector<32x512xf32>
    %cst_20 = arith.constant 1.000000e+00 : f32
    %41 = vector.broadcast %cst_20 : f32 to vector<32x512xf32>
    %42 = arith.subf %40, %41 : vector<32x512xf32>
    %cst_21 = arith.constant 1.67326319 : f32
    %43 = vector.broadcast %cst_21 : f32 to vector<32x512xf32>
    %44 = arith.mulf %43, %42 : vector<32x512xf32>
    %45 = arith.select %39, %37, %44 : vector<32x512xi1>, vector<32x512xf32>
    %cst_22 = arith.constant 1.05070102 : f32
    %46 = vector.broadcast %cst_22 : f32 to vector<32x512xf32>
    %47 = arith.mulf %46, %45 : vector<32x512xf32>
    %48 = arith.addf %47, %31 : vector<32x512xf32>
    %c0_23 = arith.constant 0 : index
    %c0_24 = arith.constant 0 : index
    %49 = vector.load %arg7[%c0_23, %c0_24] : memref<32x1xf32, #tpu.memory_space<vmem>>, vector<32x1xf32>
    %50 = vector.broadcast %49 : vector<32x1xf32> to vector<32x512xf32>
    %51 = arith.mulf %48, %50 : vector<32x512xf32>
    %c0_25 = arith.constant 0 : index
    %c0_26 = arith.constant 0 : index
    %52 = vector.load %arg8[%c0_25, %c0_26] : memref<32x1xf32, #tpu.memory_space<vmem>>, vector<32x1xf32>
    %53 = vector.broadcast %52 : vector<32x1xf32> to vector<32x512xf32>
    %54 = arith.addf %51, %53 : vector<32x512xf32>
    %cst_27 = arith.constant 0.000000e+00 : f32
    %55 = vector.broadcast %cst_27 : f32 to vector<32x512xf32>
    %56 = arith.cmpf ogt, %54, %55 : vector<32x512xf32>
    %57 = math.exp %54 : vector<32x512xf32>
    %cst_28 = arith.constant 1.000000e+00 : f32
    %58 = vector.broadcast %cst_28 : f32 to vector<32x512xf32>
    %59 = arith.subf %57, %58 : vector<32x512xf32>
    %cst_29 = arith.constant 1.67326319 : f32
    %60 = vector.broadcast %cst_29 : f32 to vector<32x512xf32>
    %61 = arith.mulf %60, %59 : vector<32x512xf32>
    %62 = arith.select %56, %54, %61 : vector<32x512xi1>, vector<32x512xf32>
    %cst_30 = arith.constant 1.05070102 : f32
    %63 = vector.broadcast %cst_30 : f32 to vector<32x512xf32>
    %64 = arith.mulf %63, %62 : vector<32x512xf32>
    %65 = arith.mulf %64, %64 : vector<32x512xf32>
    %66 = vector.extract_strided_slice %65 {offsets = [0, 0], sizes = [8, 512], strides = [1, 1]} : vector<32x512xf32> to vector<8x512xf32>
    %cst_31 = arith.constant dense<0.000000e+00> : vector<512xf32>
    %67 = vector.multi_reduction <add>, %66, %cst_31 [0] : vector<8x512xf32> to vector<512xf32>
    %68 = vector.shape_cast %67 : vector<512xf32> to vector<1x512xf32>
    %cst_32 = arith.constant 1.000000e+00 : f32
    %69 = vector.broadcast %cst_32 : f32 to vector<1x512xf32>
    %70 = arith.addf %69, %68 : vector<1x512xf32>
    %71 = arith.divf %68, %70 : vector<1x512xf32>
    %cst_33 = arith.constant 9.99999993E-9 : f32
    %72 = vector.broadcast %cst_33 : f32 to vector<1x512xf32>
    %73 = arith.addf %68, %72 : vector<1x512xf32>
    %74 = math.rsqrt %73 : vector<1x512xf32>
    %75 = arith.mulf %71, %74 : vector<1x512xf32>
    %76 = vector.extract_strided_slice %64 {offsets = [0, 0], sizes = [8, 512], strides = [1, 1]} : vector<32x512xf32> to vector<8x512xf32>
    %77 = vector.broadcast %75 : vector<1x512xf32> to vector<8x512xf32>
    %78 = arith.mulf %76, %77 : vector<8x512xf32>
    %c0_34 = arith.constant 0 : index
    %c0_35 = arith.constant 0 : index
    %79 = vector.load %arg9[%c0_34, %c0_35] : memref<32x512xf32, #tpu.memory_space<vmem>>, vector<8x512xf32>
    tpu.vector_store %arg9[%c0_34, %c0_35], %78 {strides = array<i32>} : memref<32x512xf32, #tpu.memory_space<vmem>>, vector<8x512xf32>,
    %80 = vector.extract_strided_slice %65 {offsets = [8, 0], sizes = [8, 512], strides = [1, 1]} : vector<32x512xf32> to vector<8x512xf32>
    %cst_36 = arith.constant dense<0.000000e+00> : vector<512xf32>
    %81 = vector.multi_reduction <add>, %80, %cst_36 [0] : vector<8x512xf32> to vector<512xf32>
    %82 = vector.shape_cast %81 : vector<512xf32> to vector<1x512xf32>
    %cst_37 = arith.constant 1.000000e+00 : f32
    %83 = vector.broadcast %cst_37 : f32 to vector<1x512xf32>
    %84 = arith.addf %83, %82 : vector<1x512xf32>
    %85 = arith.divf %82, %84 : vector<1x512xf32>
    %cst_38 = arith.constant 9.99999993E-9 : f32
    %86 = vector.broadcast %cst_38 : f32 to vector<1x512xf32>
    %87 = arith.addf %82, %86 : vector<1x512xf32>
    %88 = math.rsqrt %87 : vector<1x512xf32>
    %89 = arith.mulf %85, %88 : vector<1x512xf32>
    %90 = vector.extract_strided_slice %64 {offsets = [8, 0], sizes = [8, 512], strides = [1, 1]} : vector<32x512xf32> to vector<8x512xf32>
    %91 = vector.broadcast %89 : vector<1x512xf32> to vector<8x512xf32>
    %92 = arith.mulf %90, %91 : vector<8x512xf32>
    %c8 = arith.constant 8 : index
    %c0_39 = arith.constant 0 : index
    %93 = vector.load %arg9[%c8, %c0_39] : memref<32x512xf32, #tpu.memory_space<vmem>>, vector<8x512xf32>
    tpu.vector_store %arg9[%c8, %c0_39], %92 {strides = array<i32>} : memref<32x512xf32, #tpu.memory_space<vmem>>, vector<8x512xf32>,
    %94 = vector.extract_strided_slice %65 {offsets = [16, 0], sizes = [8, 512], strides = [1, 1]} : vector<32x512xf32> to vector<8x512xf32>
    %cst_40 = arith.constant dense<0.000000e+00> : vector<512xf32>
    %95 = vector.multi_reduction <add>, %94, %cst_40 [0] : vector<8x512xf32> to vector<512xf32>
    %96 = vector.shape_cast %95 : vector<512xf32> to vector<1x512xf32>
    %cst_41 = arith.constant 1.000000e+00 : f32
    %97 = vector.broadcast %cst_41 : f32 to vector<1x512xf32>
    %98 = arith.addf %97, %96 : vector<1x512xf32>
    %99 = arith.divf %96, %98 : vector<1x512xf32>
    %cst_42 = arith.constant 9.99999993E-9 : f32
    %100 = vector.broadcast %cst_42 : f32 to vector<1x512xf32>
    %101 = arith.addf %96, %100 : vector<1x512xf32>
    %102 = math.rsqrt %101 : vector<1x512xf32>
    %103 = arith.mulf %99, %102 : vector<1x512xf32>
    %104 = vector.extract_strided_slice %64 {offsets = [16, 0], sizes = [8, 512], strides = [1, 1]} : vector<32x512xf32> to vector<8x512xf32>
    %105 = vector.broadcast %103 : vector<1x512xf32> to vector<8x512xf32>
    %106 = arith.mulf %104, %105 : vector<8x512xf32>
    %c16 = arith.constant 16 : index
    %c0_43 = arith.constant 0 : index
    %107 = vector.load %arg9[%c16, %c0_43] : memref<32x512xf32, #tpu.memory_space<vmem>>, vector<8x512xf32>
    tpu.vector_store %arg9[%c16, %c0_43], %106 {strides = array<i32>} : memref<32x512xf32, #tpu.memory_space<vmem>>, vector<8x512xf32>,
    %108 = vector.extract_strided_slice %65 {offsets = [24, 0], sizes = [8, 512], strides = [1, 1]} : vector<32x512xf32> to vector<8x512xf32>
    %cst_44 = arith.constant dense<0.000000e+00> : vector<512xf32>
    %109 = vector.multi_reduction <add>, %108, %cst_44 [0] : vector<8x512xf32> to vector<512xf32>
    %110 = vector.shape_cast %109 : vector<512xf32> to vector<1x512xf32>
    %cst_45 = arith.constant 1.000000e+00 : f32
    %111 = vector.broadcast %cst_45 : f32 to vector<1x512xf32>
    %112 = arith.addf %111, %110 : vector<1x512xf32>
    %113 = arith.divf %110, %112 : vector<1x512xf32>
    %cst_46 = arith.constant 9.99999993E-9 : f32
    %114 = vector.broadcast %cst_46 : f32 to vector<1x512xf32>
    %115 = arith.addf %110, %114 : vector<1x512xf32>
    %116 = math.rsqrt %115 : vector<1x512xf32>
    %117 = arith.mulf %113, %116 : vector<1x512xf32>
    %118 = vector.extract_strided_slice %64 {offsets = [24, 0], sizes = [8, 512], strides = [1, 1]} : vector<32x512xf32> to vector<8x512xf32>
    %119 = vector.broadcast %117 : vector<1x512xf32> to vector<8x512xf32>
    %120 = arith.mulf %118, %119 : vector<8x512xf32>
    %c24 = arith.constant 24 : index
    %c0_47 = arith.constant 0 : index
    %121 = vector.load %arg9[%c24, %c0_47] : memref<32x512xf32, #tpu.memory_space<vmem>>, vector<8x512xf32>
    tpu.vector_store %arg9[%c24, %c0_47], %120 {strides = array<i32>} : memref<32x512xf32, #tpu.memory_space<vmem>>, vector<8x512xf32>,
    return
  }
  func.func @transform_0(%arg0: i32, %arg1: i32) -> (i32, i32) {
    %c0_i32 = arith.constant 0 : i32
    return %arg0, %arg1 : i32, i32
  }
  func.func @transform_1(%arg0: i32, %arg1: i32) -> (i32, i32) {
    %c0_i32 = arith.constant 0 : i32
    %c0_i32_0 = arith.constant 0 : i32
    %c0_i32_1 = arith.constant 0 : i32
    return %c0_i32, %c0_i32_0 : i32, i32
  }
  func.func @transform_2(%arg0: i32, %arg1: i32) -> (i32, i32) {
    %c0_i32 = arith.constant 0 : i32
    %c0_i32_0 = arith.constant 0 : i32
    %c0_i32_1 = arith.constant 0 : i32
    return %c0_i32, %c0_i32_0 : i32, i32
  }
  func.func @transform_3(%arg0: i32, %arg1: i32) -> (i32, i32) {
    %c0_i32 = arith.constant 0 : i32
    %c0_i32_0 = arith.constant 0 : i32
    %c0_i32_1 = arith.constant 0 : i32
    return %c0_i32, %c0_i32_0 : i32, i32
  }
  func.func @transform_4(%arg0: i32, %arg1: i32) -> (i32, i32) {
    %c0_i32 = arith.constant 0 : i32
    %c0_i32_0 = arith.constant 0 : i32
    %c0_i32_1 = arith.constant 0 : i32
    return %c0_i32, %c0_i32_0 : i32, i32
  }
  func.func @transform_5(%arg0: i32, %arg1: i32) -> (i32, i32) {
    %c0_i32 = arith.constant 0 : i32
    %c0_i32_0 = arith.constant 0 : i32
    %c0_i32_1 = arith.constant 0 : i32
    return %c0_i32, %c0_i32_0 : i32, i32
  }
  func.func @transform_6(%arg0: i32, %arg1: i32) -> (i32, i32) {
    %c0_i32 = arith.constant 0 : i32
    %c0_i32_0 = arith.constant 0 : i32
    %c0_i32_1 = arith.constant 0 : i32
    return %c0_i32, %c0_i32_0 : i32, i32
  }
  func.func @transform_7(%arg0: i32, %arg1: i32) -> (i32, i32) {
    %c0_i32 = arith.constant 0 : i32
    return %arg0, %arg1 : i32, i32
  }
}

</mosaic_0001>

<bundles_post_ra>
// kernel: tpu_custom_call.1
= control target key start
LH: loop header
LB: loop body
LE: loop exit
PB: predicated region body
PF: predicated region fallthrough
CT: control target
= control target key end

     0   :  { %12 = vsyncpa [#allocation3], 0  ;;  %s3120_s0 = inlined_call_operand.vmem [shape: f32[16,512], index: 0, kind: input, shape index: {}]   ;;  %s3121_s1 = inlined_call_operand.vmem [shape: bf16[64,8], index: 1, kind: input, shape index: {}]   ;;  %s3122_s2 = inlined_call_operand.vmem [shape: bf16[32,32], index: 2, kind: input, shape index: {}]   ;;  %s3123_s3 = inlined_call_operand.vmem [shape: f32[64,1], index: 3, kind: input, shape index: {}]   ;;  %s3124_s4 = inlined_call_operand.vmem [shape: f32[32,1], index: 4, kind: input, shape index: {}]   ;;  %s3125_s5 = inlined_call_operand.vmem [shape: f32[32,1], index: 5, kind: input, shape index: {}]   ;;  %s3126_s6 = inlined_call_operand.vmem [shape: f32[32,1], index: 6, kind: input, shape index: {}]   ;;  %s3127_s7 = inlined_call_operand.hbm [shape: f32[64,512], index: 7, kind: output, shape index: {}]  }
   0x1   :  { %14 = vsyncpa [#allocation3 + $0x1], 0  ;;  %s2120_s24 = smov 0   ;;  %s2122_s25 = smov 0  }
   0x2   :  { %s2124_s26 = smov 0   ;;  %s2126_s27 = smov 0  }
   0x3   :  { %s2128_s28 = smov 0   ;;  %s2130_s29 = smov 0  }
   0x4 LB: > { %s1637_s30 = sadd.s32 4294967295, %s2074_s29   ;;  %s1638_s8 = sadd.s32 4294967294, %s2074_s29   ;;  %s2074_s29 = sphi %s2130_s29, %s20_s29   ;;  %s2070_s28 = sphi %s2128_s28, %s3134_s28   ;;  %s2066_s27 = sphi %s2126_s27, %s3133_s27   ;;  %s2062_s26 = sphi %s2124_s26, %s3132_s26   ;;  %s2058_s25 = sphi %s2122_s25, %s3131_s25   ;;  %s2054_s24 = sphi %s2120_s24, %s3130_s24  }
   0x5   : > { %s32_s9 = sadd.s32 1, %s2070_s28  ;;  %s195_s10 = sadd.s32 1, %s2062_s26 }
   0x6   : > { %p34_p0 = scmp.ge.s32.totalorder %s32_s9, 2  ;;  %p205_p1 = scmp.ne.s32.totalorder %s2062_s26, %s2058_s25 }
   0x7   : > { %p206_p2 = scmp.eq.s32.totalorder %s1637_s30, 1  ;;  %p211_p3 = scmp.ne.s32.totalorder %s2058_s25, %s2054_s24 }
   0x8   : > { %s3136_s9 = smov (%p34_p0, %s32_s9), 0  ;;  %p212_p5 = scmp.eq.s32.totalorder %s1638_s8, 1 }
   0x9   : > { %p2160_p4 = por %p206_p2, %p205_p1  ;;  %s190_s12 = ssub.s32 %s2070_s28, %s3136_s9 }
   0xa   : > { %p1641_p6 = scmp.ge.s32.totalorder %s2074_s29, 1  ;;  %p193_p7 = scmp.eq.s32.totalorder %s190_s12, 0 }
   0xb   : > { %p2167_p8 = por %p212_p5, %p211_p3  ;;  %p261_p9 = scmp.lt.s32.totalorder %s2074_s29, 3 }
   0xc   : > { %s2173_s14 = scalar_select %p193_p7, %s2062_s26, %s195_s10  }
   0xd   : > { %p262_p10 = pnand %p1641_p6, %p261_p9 }
   0xe   : > { %p298_p11 = scmp.lt.s32.totalorder (!%p262_p10), %s2066_s27, 1  ;;  %v2076_v0 = vmov (!%p262_p10), 0   ;;  %v518_v1 = vld [vmem:[%s3123_s3] sm:$0xff] (!%p262_p10)  ;;  %v520_v2 = vld [vmem:[%s3123_s3 + $0x10] sm:$0xff] (!%p262_p10)  ;;  %vm359_vm0 = vcmask (!%p262_p10), 1043456   ;;  %v519_v10 = vld [vmem:[%s3123_s3 + $0x8] sm:$0xff] (!%p262_p10) }
   0xf   : > { %265 = sbr.rel (%p262_p10) target bundleno = 697 (0x2b9), region = 48  ;;  %404 = vmatprep.mubr.bf16.mxu0 (!%p262_p10), %v2076_v0  ;;  %477 = vmatprep.mubr.bf16.mxu1 (!%p262_p10), %v2076_v0  ;;  %v521_v12 = vld [vmem:[%s3123_s3 + $0x18] sm:$0xff] (!%p262_p10)  ;;  %v1798_v14 = vld [vmem:[%s3121_s1] sm:$0xff] (!%p262_p10)   ;;  %vm346_vm1 = vcmask (!%p262_p10), 64512   ;;  %v671_v17 = vld [vmem:[%s3123_s3 + $0x28] sm:$0xff] (!%p262_p10)  ;;  %s294_s20 = sand.u32 (!%p262_p10), 1, %s2058_s25  }
  0x10   : > { %1796 = vset.pattern.permute.xlu0 (!%p262_p10), %v2076_v0  ;;  %1797 = vset.pattern.permute.xlu1 (!%p262_p10), %v2076_v0  ;;  %v670_v16 = vld [vmem:[%s3123_s3 + $0x20] sm:$0xff] (!%p262_p10)  ;;  %v672_v18 = vld [vmem:[%s3123_s3 + $0x30] sm:$0xff] (!%p262_p10)  ;;  %v1799_v19 = vld [vmem:[%s3121_s1 + $0x8] sm:$0xff] (!%p262_p10)   ;;  %s1737_s23 = sshll.u32 (!%p262_p10), %s2066_s27, 11 }
  0x11   : > { %524 = vperm.xlu0 (!%p262_p10), %1796, %v518_v1   ;;  %534 = vperm.xlu1 (!%p262_p10), %1797, %v520_v2   ;;  %v673_v20 = vld [vmem:[%s3123_s3 + $0x38] sm:$0xff] (!%p262_p10)  ;;  %v834_v21 = vld [vmem:[%s3124_s4] sm:$0xff] (!%p262_p10)  ;;  %v835_v22 = vld [vmem:[%s3124_s4 + $0x8] sm:$0xff] (!%p262_p10)  ;;  %s3067_s12 = scalar_lea.hbm (!%p262_p10), %s3127_s7, %s1737_s23 }
  0x12   : > { %v836_v23 = vld [vmem:[%s3124_s4 + $0x10] sm:$0xff] (!%p262_p10)  ;;  %v837_v25 = vld [vmem:[%s3124_s4 + $0x18] sm:$0xff] (!%p262_p10)  ;;  %v1109_v26 = vld [vmem:[%s3125_s5] sm:$0xff] (!%p262_p10) }
  0x13   : > { %v1800_v24 = vld [vmem:[%s3121_s1 + $0x10] sm:$0xff] (!%p262_p10)   ;;  %v1110_v27 = vld [vmem:[%s3125_s5 + $0x8] sm:$0xff] (!%p262_p10)  ;;  %v1801_v29 = vld [vmem:[%s3121_s1 + $0x18] sm:$0xff] (!%p262_p10)  }
  0x14   : > { %v1111_v28 = vld [vmem:[%s3125_s5 + $0x10] sm:$0xff] (!%p262_p10)  ;;  %v1112_v30 = vld [vmem:[%s3125_s5 + $0x18] sm:$0xff] (!%p262_p10)  ;;  %v1149_v31 = vld [vmem:[%s3126_s6] sm:$0xff] (!%p262_p10) }
  0x15   : > { %529 = vperm.xlu0 (!%p262_p10), %1796, %v519_v10   ;;  %539 = vperm.xlu1 (!%p262_p10), %1797, %v521_v12   ;;  %v1150_v32 = vld [vmem:[%s3126_s6 + $0x8] sm:$0xff] (!%p262_p10)  ;;  %v1151_v33 = vld [vmem:[%s3126_s6 + $0x10] sm:$0xff] (!%p262_p10)  ;;  %v1152_v34 = vld [vmem:[%s3126_s6 + $0x18] sm:$0xff] (!%p262_p10) }
  0x16   : > { %s299_s15 = scalar_select %p298_p11, %s2066_s27, 1 }
  0x17   : > { %s2077_s27 = smov [#allocation2]  }
  0x18   : > { %s1735_s16 = sshll.u32 %s299_s15, 5  ;;  %s3074_s15 = scalar_lea.sflag [#allocation3], %s294_s20 }
  0x19   : > { %s305_s21 = scalar_lea.vmem %s3120_s0, %s1735_s16  ;;  %676 = vperm.xlu0 %1796, %v670_v16   ;;  %681 = vperm.xlu1 %1797, %v671_v17   ;;  %s2000_s17 = sshll.u32 %s2077_s27, 4  ;;  %s2001_s17 = int_to_ptr.vmem [resolvable:$false] %s2000_s17 }
  0x1a   : > { %v311_v3 = vld [vmem:[%s305_s21 + $0x8] sm:$0xff]  ;;  %v313_v4 = vld [vmem:[%s305_s21 + $0x18] sm:$0xff]  ;;  %v310_v5 = vld [vmem:[%s305_s21] sm:$0xff]  ;;  %s2002_s18 = scalar_lea.vmem %s2001_s17, 4096 }
  0x1b   : > { %v315_v6 = vpack.c.bf16 %v311_v3, %v311_v3  ;;  %v317_v7 = vpack.c.bf16 %v313_v4, %v313_v4  ;;  %v314_v8 = vpack.c.bf16 %v310_v5, %v310_v5  ;;  %v312_v9 = vld [vmem:[%s305_s21 + $0x10] sm:$0xff]  ;;  %s2923_s21 = sshll.u32 %s294_s20, 7 }
  0x1c   : > { %v316_v11 = vpack.c.bf16 %v312_v9, %v312_v9  ;;  %s2943_s22 = scalar_lea.vmem [#allocation2], %s2923_s21 }
  0x1d   : > { %1649 = vmatprep.subr.msk.bf16.mxu0 %vm359_vm0, %v315_v6  ;;  %1654 = vmatprep.subr.msk.bf16.mxu1 %vm359_vm0, %v317_v7  ;;  %v361_v13 = vsel %vm359_vm0, %v314_v8, 0  ;;  %s1558_s30 = sshll.u32 %s2943_s22, 4  ;;  %s3069_s30 = int_to_ptr.vmem [resolvable:$true] %s1558_s30 }
  0x1e   : > { %373 = vmatpush1.bf16.msra.mxu0 %v361_v13  ;;  %v367_v15 = vsel %vm359_vm0, %v316_v11, 0  ;;  %686 = vperm.xlu0 %1796, %v672_v18   ;;  %s1996_s16 = scalar_lea.vmem %s3069_s30, 2048  ;;  %p2003_p1 = scmp.lt.s32.totalorder %s3069_s30, %s2001_s17 }
  0x1f   : > { %446 = vmatpush1.bf16.msra.mxu1 %v367_v15  ;;  %691 = vperm.xlu1 %1797, %v673_v20   ;;  %p1997_p12 = scmp.ne.s32.totalorder %s3069_s30, %s1996_s16  ;;  %p2004_p2 = scmp.lt.s32.totalorder %s2002_s18, %s1996_s16 }
  0x21   : > { %1650 = vmatmul.mubr.msk.bf16.vlgmr.msra.gmra.mrb[0].mxu0 %vm346_vm1, %v1798_v14  ;;  %p1998_p13 = pnand %p1997_p12, %p2160_p4  ;;  %p2005_p3 = por %p2004_p2, %p2003_p1 }
  0x22   : > { %1655 = vmatmul.mubr.msk.bf16.vlgmr.msra.gmra.mrb[0].mxu1 %vm346_vm1, %v1798_v14  ;;  %414 = vmatprep.mubr.bf16.mxu0 %v2076_v0 }
  0x23   : > { %487 = vmatprep.mubr.bf16.mxu1 %v2076_v0  ;;  %840 = vperm.xlu0 %1796, %v834_v21   ;;  %p1999_p0 = pneg %p1998_p13 }
  0x24   : > { %845 = vperm.xlu1 %1797, %v835_v22  }
  0x25   : > { %p2006_p5 = pnand %p2005_p3, %p1999_p0 }
  0x27   : > { %850 = vperm.xlu0 %1796, %v836_v23  }
  0x28   : > { %855 = vperm.xlu1 %1797, %v837_v25  }
  0x29   : > { %1651 = vmatmul.mubr.msk.bf16.gmra.mrb[4].mxu0 %vm346_vm1, %v1799_v19 }
  0x2a   : > { %1656 = vmatmul.mubr.msk.bf16.gmra.mrb[4].mxu1 %vm346_vm1, %v1799_v19  ;;  %424 = vmatprep.mubr.bf16.mxu0 %v2076_v0 }
  0x2b   : > { %497 = vmatprep.mubr.bf16.mxu1 %v2076_v0  ;;  %1115 = vperm.xlu0 %1796, %v1109_v26  }
  0x2c   : > { %1120 = vperm.xlu1 %1797, %v1110_v27  }
  0x2f   : > { %1125 = vperm.xlu0 %1796, %v1111_v28  }
  0x30   : > { %1130 = vperm.xlu1 %1797, %v1112_v30  }
  0x31   : > { %1652 = vmatmul.mubr.msk.bf16.gmra.mrb[8].mxu0 %vm346_vm1, %v1800_v24 }
  0x32   : > { %1657 = vmatmul.mubr.msk.bf16.gmra.mrb[8].mxu1 %vm346_vm1, %v1800_v24  ;;  %434 = vmatprep.mubr.bf16.mxu0 %v2076_v0 }
  0x33   : > { %507 = vmatprep.mubr.bf16.mxu1 %v2076_v0  ;;  %1155 = vperm.xlu0 %1796, %v1149_v31  }
  0x34   : > { %1160 = vperm.xlu1 %1797, %v1150_v32  }
  0x37   : > { %1165 = vperm.xlu0 %1796, %v1151_v33  }
  0x38   : > { %1170 = vperm.xlu1 %1797, %v1152_v34  }
  0x39   : > { %1653 = vmatmul.mubr.msk.bf16.gmra.mrb[12].mxu0 %vm346_vm1, %v1801_v29 }
  0x3a   : > { %1658 = vmatmul.mubr.msk.bf16.gmra.mrb[12].mxu1 %vm346_vm1, %v1801_v29  ;;  %907 = vmatprep.mubr.bf16.mxu0 %v2076_v0 }
  0x3b   : > { %960 = vmatprep.mubr.bf16.mxu1 %v2076_v0 }
  0x90   : > { %v2276_v35 = vpop.permute.xlu0 %524  ;;  %v2295_v52 = vpop.permute.xlu1 %534 }
  0x94   : > { %v2278_v36 = vpop.permute.xlu0 %529  ;;  %v2311_v2 = vpop.permute.xlu1 %539 }
  0xf4   : > { %v406_v37 = vpop.f32.mrb[0].mxu0 }
  0xf5   : > { %v2281_v38 = vadd.f32 %v2276_v35, %v406_v37  ;;  %v479_v39 = vpop.f32.mrb[0].mxu1  ;;  %v408_v40 = vpop.f32.mrb[1].mxu0 }
  0xf6   : > { %v2284_v41 = vadd.f32 %v2276_v35, %v479_v39  ;;  %v481_v42 = vpop.f32.mrb[1].mxu1  ;;  %v410_v43 = vpop.f32.mrb[2].mxu0  ;;  %v2333_v20 = vadd.f32 %v2276_v35, %v408_v40 }
  0xf7   : > { %v574_v44 = vmul.f32 1.442695, %v2281_v38  ;;  %v2288_v45 = vadd.f32 %v2278_v36, %v410_v43  ;;  %v483_v46 = vpop.f32.mrb[2].mxu1  ;;  %v412_v47 = vpop.f32.mrb[3].mxu0  ;;  %vm558_vm2 = vcmp.gt.f32.partialorder %v2281_v38, 0.0  ;;  %v2348_v29 = vadd.f32 %v2276_v35, %v481_v42 }
  0xf8   : > { %v578_v48 = vmul.f32 1.442695, %v2284_v41  ;;  %v485_v49 = vpop.f32.mrb[3].mxu1  ;;  %v2293_v51 = vadd.f32 %v2278_v36, %v483_v46  ;;  %v2338_v24 = vadd.f32 %v2278_v36, %v412_v47  ;;  %vm560_vm3 = vcmp.gt.f32.partialorder %v2284_v41, 0.0 }
  0xf9   : > { %1804 = vpow2.f32 %v574_v44  ;;  %v582_v50 = vmul.f32 1.442695, %v2288_v45  ;;  %v576_v32 = vmul.f32 1.442695, %v2333_v20  ;;  %vm562_vm4 = vcmp.gt.f32.partialorder %v2288_v45, 0.0 }
  0xfa   : > { %1806 = vpow2.f32 %v578_v48  ;;  %v586_v53 = vmul.f32 1.442695, %v2293_v51  ;;  %vm564_vm5 = vcmp.gt.f32.partialorder %v2293_v51, 0.0  ;;  %v2357_v39 = vadd.f32 %v2278_v36, %v485_v49 }
  0xfb   : > { %1808 = vpow2.f32 %v582_v50  ;;  %v580_v50 = vmul.f32 1.442695, %v2348_v29  ;;  %vm563_vm10 = vcmp.gt.f32.partialorder %v2338_v24, 0.0  ;;  %vm559_vm11 = vcmp.gt.f32.partialorder %v2333_v20, 0.0 }
  0xfc   : > { %v416_v54 = vpop.f32.mrb[4].mxu0  ;;  %1810 = vpow2.f32 %v586_v53  ;;  %vm565_vm12 = vcmp.gt.f32.partialorder %v2357_v39, 0.0  ;;  %vm561_vm14 = vcmp.gt.f32.partialorder %v2348_v29, 0.0 }
  0xfd   : > { %v489_v55 = vpop.f32.mrb[4].mxu1  ;;  %v2299_v56 = vadd.f32 %v2295_v52, %v416_v54  ;;  %v2304_v58 = vpop.f32.mrb[5].mxu0 }
  0xfe   : > { %v2302_v57 = vadd.f32 %v2295_v52, %v489_v55  ;;  %v2306_v59 = vpop.f32.mrb[5].mxu1  ;;  %v420_v60 = vpop.f32.mrb[6].mxu0 }
  0xff   : > { %v493_v61 = vpop.f32.mrb[6].mxu1  ;;  %v590_v62 = vmul.f32 1.442695, %v2299_v56  ;;  %v422_v63 = vpop.f32.mrb[7].mxu0  ;;  %v2315_v4 = vadd.f32 %v2311_v2, %v420_v60  ;;  %vm566_vm6 = vcmp.gt.f32.partialorder %v2299_v56, 0.0 }
 0x100   : > { %v2309_v1 = vpop.f32.mrb[7].mxu1  ;;  %v594_v3 = vmul.f32 1.442695, %v2302_v57  ;;  %v2318_v5 = vadd.f32 %v2311_v2, %v493_v61  ;;  %v2373_v36 = vadd.f32 %v2311_v2, %v422_v63  ;;  %v2388_v63 = vadd.f32 %v2295_v52, %v2304_v58 }
 0x101   : > { %1812 = vpow2.f32 %v590_v62  ;;  %v598_v9 = vmul.f32 1.442695, %v2315_v4  ;;  %vm568_vm7 = vcmp.gt.f32.partialorder %v2302_v57, 0.0  ;;  %vm570_vm8 = vcmp.gt.f32.partialorder %v2315_v4, 0.0 }
 0x102   : > { %1814 = vpow2.f32 %v594_v3  ;;  %v602_v12 = vmul.f32 1.442695, %v2318_v5  ;;  %v600_v58 = vmul.f32 1.442695, %v2373_v36  ;;  %vm572_vm9 = vcmp.gt.f32.partialorder %v2318_v5, 0.0 }
 0x103   : > { %v1805_v6 = vpop.eup %1804  ;;  %1816 = vpow2.f32 %v598_v9  ;;  %v2395_v9 = vadd.f32 %v2311_v2, %v2309_v1  ;;  %vm571_vm13 = vcmp.gt.f32.partialorder %v2373_v36, 0.0  ;;  %vm567_vm15 = vcmp.gt.f32.partialorder %v2388_v63, 0.0 }
 0x104   : > { %v1807_v7 = vpop.eup %1806  ;;  %v1659_v8 = vadd.f32 -1.0, %v1805_v6  ;;  %v2321_v10 = vpop.f32.mrb[8].mxu0  ;;  %1818 = vpow2.f32 %v602_v12 }
 0x105   : > { %v1661_v11 = vadd.f32 -1.0, %v1807_v7  ;;  %v2324_v13 = vpop.f32.mrb[8].mxu1  ;;  %v2326_v14 = vpop.f32.mrb[9].mxu0  ;;  %v588_v7 = vmul.f32 1.442695, %v2357_v39  ;;  %vm573_vm0 = vcmp.gt.f32.partialorder %v2395_v9, 0.0 }
 0x106   : > { %v622_v15 = vmul.f32 1.6732632, %v1659_v8  ;;  %v2328_v16 = vpop.f32.mrb[9].mxu1  ;;  %v2330_v17 = vpop.f32.mrb[10].mxu0 }
 0x107   : > { %v1809_v18 = vpop.eup %1808  ;;  %v624_v19 = vmul.f32 1.6732632, %v1661_v11  ;;  %v2335_v21 = vpop.f32.mrb[10].mxu1 }
 0x108   : > { %v1811_v22 = vpop.eup %1810  ;;  %v1663_v23 = vadd.f32 -1.0, %v1809_v18  ;;  %v2340_v25 = vpop.f32.mrb[11].mxu0  ;;  %v638_v28 = vsel %vm558_vm2, %v2281_v38, %v622_v15  ;;  %v584_v38 = vmul.f32 1.442695, %v2338_v24  ;;  %vm868_vm2 = vcmask 261120  }
 0x109   : > { %v2342_v26 = vpop.f32.mrb[11].mxu1  ;;  %v1665_v27 = vadd.f32 -1.0, %v1811_v22  ;;  %v640_v31 = vsel %vm560_vm3, %v2284_v41, %v624_v19  ;;  %v2361_v42 = vmul.f32 1.050701, %v638_v28  ;;  %v2407_v19 = vadd.f32 %v2295_v52, %v2306_v59 }
 0x10a   : > { %v626_v30 = vmul.f32 1.6732632, %v1663_v23  ;;  %1820 = vpow2.f32 %v584_v38  ;;  %v592_v22 = vmul.f32 1.442695, %v2388_v63 }
 0x10b   : > { %v628_v33 = vmul.f32 1.6732632, %v1665_v27  ;;  %v1813_v34 = vpop.eup %1812  ;;  %1822 = vpow2.f32 %v576_v32  ;;  %v596_v59 = vmul.f32 1.442695, %v2407_v19  ;;  %vm569_vm1 = vcmp.gt.f32.partialorder %v2407_v19, 0.0 }
 0x10c   : > { %v642_v37 = vsel %vm562_vm4, %v2288_v45, %v626_v30  ;;  %v2359_v35 = vpop.f32.mrb[12].mxu0  ;;  %v1815_v40 = vpop.eup %1814  ;;  %v1667_v44 = vadd.f32 -1.0, %v1813_v34  ;;  %v2368_v45 = vmul.f32 1.050701, %v640_v31  ;;  %1824 = vpow2.f32 %v588_v7 }
 0x10d   : > { %v2363_v41 = vmul.f32 1.050701, %v642_v37  ;;  %v644_v43 = vsel %vm564_vm5, %v2293_v51, %v628_v33  ;;  %v2366_v46 = vpop.f32.mrb[12].mxu1  ;;  %v1669_v48 = vadd.f32 -1.0, %v1815_v40  ;;  %v2375_v49 = vpop.f32.mrb[13].mxu0  ;;  %1826 = vpow2.f32 %v600_v58 }
 0x10e   : > { %v2370_v47 = vmul.f32 1.050701, %v644_v43  ;;  %v630_v54 = vmul.f32 1.6732632, %v1667_v44  ;;  %v2380_v51 = vpop.f32.mrb[13].mxu1  ;;  %v2382_v55 = vpop.f32.mrb[14].mxu0  ;;  %1828 = vpow2.f32 %v580_v50 }
 0x10f   : > { %v826_v53 = vpack.c.bf16 %v2363_v41, %v2361_v42  ;;  %v1817_v60 = vpop.eup %1816  ;;  %v632_v62 = vmul.f32 1.6732632, %v1669_v48  ;;  %v2390_v3 = vpop.f32.mrb[14].mxu1  ;;  %1830 = vpow2.f32 %v592_v22  ;;  %v1803_v42 = vld [vmem:[%s3122_s2 + $0x8] sm:$0xff]  }
 0x110   : > { %v828_v61 = vpack.c.bf16 %v2370_v47, %v2368_v45  ;;  %v1819_v6 = vpop.eup %1818  ;;  %v1671_v8 = vadd.f32 -1.0, %v1817_v60  ;;  %v2397_v11 = vpop.f32.mrb[15].mxu0  ;;  %v646_v18 = vsel %vm566_vm6, %v2299_v56, %v630_v54  ;;  %v604_v56 = vmul.f32 1.442695, %v2395_v9 }
 0x111   : > { %v2399_v12 = vpop.f32.mrb[15].mxu1  ;;  %v1673_v15 = vadd.f32 -1.0, %v1819_v6  ;;  %v648_v2 = vsel %vm568_vm7, %v2302_v57, %v632_v62  ;;  %v2415_v28 = vmul.f32 1.050701, %v646_v18  ;;  %v677_v41 = vpop.permute.xlu0 %676 }
 0x112   : > { %v634_v1 = vmul.f32 1.6732632, %v1671_v8  ;;  %v2420_v57 = vmul.f32 1.050701, %v648_v2  ;;  %1832 = vpow2.f32 %v604_v56  ;;  %v2463_v45 = vadd.f32 %v677_v41, %v2321_v10 }
 0x113   : > { %v636_v23 = vmul.f32 1.6732632, %v1673_v15  ;;  %1834 = vpow2.f32 %v596_v59  ;;  %v2466_v47 = vadd.f32 %v677_v41, %v2324_v13 }
 0x114   : > { %v650_v27 = vsel %vm570_vm8, %v2315_v4, %v634_v1  ;;  %v1821_v33 = vpop.eup %1820  ;;  %vm710_vm3 = vcmp.gt.f32.partialorder %v2463_v45, 0.0 }
 0x115   : > { %v2417_v30 = vmul.f32 1.050701, %v650_v27  ;;  %v652_v52 = vsel %vm572_vm9, %v2318_v5, %v636_v23  ;;  %v1823_v34 = vpop.eup %1822  ;;  %v1664_v5 = vadd.f32 -1.0, %v1821_v33  ;;  %vm712_vm4 = vcmp.gt.f32.partialorder %v2466_v47, 0.0 }
 0x116   : > { %v2423_v31 = vmul.f32 1.050701, %v652_v52  ;;  %v1825_v37 = vpop.eup %1824  ;;  %v1660_v38 = vadd.f32 -1.0, %v1823_v34 }
 0x117   : > { %v830_v4 = vpack.c.bf16 %v2417_v30, %v2415_v28  ;;  %v1827_v40 = vpop.eup %1826  ;;  %v627_v44 = vmul.f32 1.6732632, %v1664_v5  ;;  %v1666_v50 = vadd.f32 -1.0, %v1825_v37 }
 0x118   : > { %v832_v32 = vpack.c.bf16 %v2423_v31, %v2420_v57  ;;  %v1829_v43 = vpop.eup %1828  ;;  %v623_v60 = vmul.f32 1.6732632, %v1660_v38  ;;  %v1672_v62 = vadd.f32 -1.0, %v1827_v40  ;;  %v730_v31 = vmul.f32 1.442695, %v2466_v47 }
 0x119   : > { %v1831_v48 = vpop.eup %1830  ;;  %v1662_v6 = vadd.f32 -1.0, %v1829_v43  ;;  %v643_v8 = vsel %vm563_vm10, %v2338_v24, %v627_v44  ;;  %v629_v58 = vmul.f32 1.6732632, %v1666_v50 }
 0x11a   : > { %v1668_v15 = vadd.f32 -1.0, %v1831_v48  ;;  %v639_v1 = vsel %vm559_vm11, %v2333_v20, %v623_v60  ;;  %v635_v2 = vmul.f32 1.6732632, %v1672_v62  ;;  %v659_v23 = vmul.f32 1.050701, %v643_v8 }
 0x11b   : > { %v625_v22 = vmul.f32 1.6732632, %v1662_v6  ;;  %v655_v28 = vmul.f32 1.050701, %v639_v1  ;;  %v645_v30 = vsel %vm565_vm12, %v2357_v39, %v629_v58 }
 0x11c   : > { %v1833_v54 = vpop.eup %1832  ;;  %v631_v56 = vmul.f32 1.6732632, %v1668_v15  ;;  %v651_v52 = vsel %vm571_vm13, %v2373_v36, %v635_v2  ;;  %v661_v34 = vmul.f32 1.050701, %v645_v30 }
 0x11d   : > { %v1835_v7 = vpop.eup %1834  ;;  %v1674_v18 = vadd.f32 -1.0, %v1833_v54  ;;  %v641_v59 = vsel %vm561_vm14, %v2348_v29, %v625_v22  ;;  %v827_v33 = vpack.c.bf16 %v659_v23, %v655_v28  ;;  %v667_v37 = vmul.f32 1.050701, %v651_v52 }
 0x11e   : > { %v1670_v27 = vadd.f32 -1.0, %v1835_v7  ;;  %v647_v5 = vsel %vm567_vm15, %v2388_v63, %v631_v56  ;;  %v657_v38 = vmul.f32 1.050701, %v641_v59 }
 0x11f   : > { %v637_v24 = vmul.f32 1.6732632, %v1674_v18  ;;  %875 = vmatprep.subr.bf16.mxu0 %v827_v33  ;;  %v663_v29 = vmul.f32 1.050701, %v647_v5 }
 0x120   : > { %v633_v20 = vmul.f32 1.6732632, %v1670_v27  ;;  %876 = vmatpush1.bf16.msra.mxu0 %v826_v53  ;;  %v829_v43 = vpack.c.bf16 %v661_v34, %v657_v38  ;;  %v2469_v53 = vadd.f32 %v677_v41, %v2326_v14  ;;  %v687_v14 = vpop.permute.xlu0 %686 }
 0x121   : > { %v653_v39 = vsel %vm573_vm0, %v2395_v9, %v637_v24  ;;  %v831_v44 = vpack.c.bf16 %v667_v37, %v663_v29  ;;  %v1802_v9 = vld [vmem:[%s3122_s2] sm:$0xff]   ;;  %v2492_v50 = vadd.f32 %v687_v14, %v2359_v35  ;;  %v2496_v54 = vadd.f32 %v687_v14, %v2366_v46 }
 0x122   : > { %v649_v36 = vsel %vm569_vm1, %v2407_v19, %v633_v20  ;;  %v669_v40 = vmul.f32 1.050701, %v653_v39  ;;  %928 = vmatprep.subr.bf16.mxu1 %v829_v43  ;;  %v2472_v19 = vadd.f32 %v677_v41, %v2328_v16  ;;  %v728_v13 = vmul.f32 1.442695, %v2469_v53 }
 0x123   : > { %v665_v63 = vmul.f32 1.050701, %v649_v36  ;;  %929 = vmatpush1.bf16.msra.mxu1 %v828_v61  ;;  %877 = vmatprep.subr.bf16.mxu0 %v831_v44  ;;  %v682_v61 = vpop.permute.xlu1 %681  ;;  %v746_v62 = vmul.f32 1.442695, %v2496_v54  ;;  %v2503_v35 = vadd.f32 %v687_v14, %v2375_v49  ;;  %v2508_v46 = vadd.f32 %v687_v14, %v2380_v51 }
 0x124   : > { %878 = vmatpush1.bf16.msra.mxu0 %v830_v4  ;;  %v2476_v57 = vadd.f32 %v682_v61, %v2330_v17  ;;  %v2480_v10 = vadd.f32 %v682_v61, %v2335_v21  ;;  %v2484_v4 = vadd.f32 %v682_v61, %v2340_v25  ;;  %v2488_v16 = vadd.f32 %v682_v61, %v2342_v26 }
 0x125   : > { %v833_v48 = vpack.c.bf16 %v669_v40, %v665_v63  ;;  %v742_v26 = vmul.f32 1.442695, %v2492_v50  ;;  %v744_v7 = vmul.f32 1.442695, %v2503_v35  ;;  %v748_v1 = vmul.f32 1.442695, %v2508_v46 }
 0x126   : > { %v734_v17 = vmul.f32 1.442695, %v2476_v57  ;;  %v738_v21 = vmul.f32 1.442695, %v2480_v10  ;;  %v736_v25 = vmul.f32 1.442695, %v2484_v4 }
 0x127   : > { %930 = vmatprep.subr.bf16.mxu1 %v833_v48  ;;  %1693 = vmatmul.mubr.msk.bf16.vlgmr.msra.gmra.mrb[16].mxu0 %vm868_vm2, %v1802_v9  ;;  %v740_v60 = vmul.f32 1.442695, %v2488_v16  ;;  %v2505_v6 = vpop.permute.xlu1 %691  ;;  %vm711_vm5 = vcmp.gt.f32.partialorder %v2469_v53, 0.0  ;;  %vm713_vm6 = vcmp.gt.f32.partialorder %v2472_v19, 0.0  ;;  %vm714_vm7 = vcmp.gt.f32.partialorder %v2476_v57, 0.0 }
 0x128   : > { %931 = vmatpush1.bf16.msra.mxu1 %v832_v32  ;;  %917 = vmatprep.mubr.bf16.mxu0 %v2076_v0  ;;  %v732_v32 = vmul.f32 1.442695, %v2472_v19  ;;  %v2513_v8 = vadd.f32 %v2505_v6, %v2382_v55  ;;  %v2517_v49 = vadd.f32 %v2505_v6, %v2390_v3  ;;  %v2524_v55 = vadd.f32 %v2505_v6, %v2397_v11 }
 0x129   : > { %vm716_vm8 = vcmp.gt.f32.partialorder %v2480_v10, 0.0  ;;  %vm715_vm9 = vcmp.gt.f32.partialorder %v2484_v4, 0.0  ;;  %vm717_vm10 = vcmp.gt.f32.partialorder %v2488_v16, 0.0  ;;  %vm718_vm11 = vcmp.gt.f32.partialorder %v2492_v50, 0.0 }
 0x12a   : > { %v750_v51 = vmul.f32 1.442695, %v2513_v8  ;;  %v754_v23 = vmul.f32 1.442695, %v2517_v49  ;;  %v752_v34 = vmul.f32 1.442695, %v2524_v55 }
 0x12b   : > { %1695 = vmatmul.mubr.msk.bf16.vlgmr.msra.gmra.mrb[16].mxu1 %vm868_vm2, %v1802_v9  ;;  %vm720_vm12 = vcmp.gt.f32.partialorder %v2496_v54, 0.0  ;;  %vm719_vm13 = vcmp.gt.f32.partialorder %v2503_v35, 0.0  ;;  %vm721_vm14 = vcmp.gt.f32.partialorder %v2508_v46, 0.0  ;;  %vm722_vm15 = vcmp.gt.f32.partialorder %v2513_v8, 0.0 }
 0x12c   : > { %970 = vmatprep.mubr.bf16.mxu1 %v2076_v0  ;;  %v726_v0 = vmul.f32 1.442695, %v2463_v45  ;;  %vm724_vm0 = vcmp.gt.f32.partialorder %v2517_v49, 0.0  ;;  %vm723_vm1 = vcmp.gt.f32.partialorder %v2524_v55, 0.0 }
 0x12e   : > { %1836 = vpow2.f32 %v726_v0 }
 0x12f   : > { %1694 = vmatmul.mubr.msk.bf16.gmra.mrb[20].mxu0 %vm868_vm2, %v1803_v42  ;;  %1838 = vpow2.f32 %v730_v31 }
 0x130   : > { %1840 = vpow2.f32 %v728_v13 }
 0x131   : > { %1842 = vpow2.f32 %v732_v32 }
 0x132   : > { %1844 = vpow2.f32 %v734_v17 }
 0x133   : > { %1696 = vmatmul.mubr.msk.bf16.gmra.mrb[20].mxu1 %vm868_vm2, %v1803_v42  ;;  %1846 = vpow2.f32 %v738_v21 }
 0x134   : > { %1848 = vpow2.f32 %v736_v25 }
 0x135   : > { %1850 = vpow2.f32 %v740_v60 }
 0x136   : > { %1852 = vpow2.f32 %v742_v26 }
 0x137   : > { %1854 = vpow2.f32 %v746_v62  ;;  %v2570_v62 = vadd.f32 %v2505_v6, %v2399_v12  ;;  %v841_v6 = vpop.permute.xlu0 %840 }
 0x138   : > { %v1837_v15 = vpop.eup %1836  ;;  %1856 = vpow2.f32 %v744_v7 }
 0x139   : > { %v1839_v58 = vpop.eup %1838  ;;  %v1675_v28 = vadd.f32 -1.0, %v1837_v15  ;;  %1858 = vpow2.f32 %v748_v1 }
 0x13a   : > { %v1841_v18 = vpop.eup %1840  ;;  %v1677_v3 = vadd.f32 -1.0, %v1839_v58  ;;  %1860 = vpow2.f32 %v750_v51 }
 0x13b   : > { %v1843_v2 = vpop.eup %1842  ;;  %v1676_v24 = vadd.f32 -1.0, %v1841_v18  ;;  %1862 = vpow2.f32 %v754_v23  ;;  %v774_v5 = vmul.f32 1.6732632, %v1675_v28 }
 0x13c   : > { %v1845_v22 = vpop.eup %1844  ;;  %v1678_v59 = vadd.f32 -1.0, %v1843_v2  ;;  %v776_v37 = vmul.f32 1.6732632, %v1677_v3  ;;  %1864 = vpow2.f32 %v752_v34 }
 0x13d   : > { %v1847_v27 = vpop.eup %1846  ;;  %v1679_v20 = vadd.f32 -1.0, %v1845_v22  ;;  %v775_v29 = vmul.f32 1.6732632, %v1676_v24  ;;  %v790_v48 = vsel %vm710_vm3, %v2463_v45, %v774_v5 }
 0x13e   : > { %v1849_v56 = vpop.eup %1848  ;;  %v1681_v11 = vadd.f32 -1.0, %v1847_v27  ;;  %v777_v40 = vmul.f32 1.6732632, %v1678_v59  ;;  %v792_v42 = vsel %vm712_vm4, %v2466_v47, %v776_v37  ;;  %v2552_v21 = vmul.f32 1.050701, %v790_v48 }
 0x13f   : > { %v1851_v30 = vpop.eup %1850  ;;  %v1680_v39 = vadd.f32 -1.0, %v1849_v56  ;;  %v778_v43 = vmul.f32 1.6732632, %v1679_v20  ;;  %v791_v0 = vsel %vm711_vm5, %v2469_v53, %v775_v29  ;;  %v2554_v53 = vmul.f32 1.050701, %v792_v42 }
 0x140   : > { %v1853_v52 = vpop.eup %1852  ;;  %v1682_v38 = vadd.f32 -1.0, %v1851_v30  ;;  %v780_v9 = vmul.f32 1.6732632, %v1681_v11  ;;  %v793_v45 = vsel %vm713_vm6, %v2472_v19, %v777_v40  ;;  %v2560_v26 = vmul.f32 1.050701, %v791_v0 }
 0x141   : > { %v1855_v33 = vpop.eup %1854  ;;  %v1683_v36 = vadd.f32 -1.0, %v1853_v52  ;;  %v779_v41 = vmul.f32 1.6732632, %v1680_v39  ;;  %v794_v47 = vsel %vm714_vm7, %v2476_v57, %v778_v43  ;;  %v2572_v7 = vmul.f32 1.050701, %v793_v45 }
 0x142   : > { %v1685_v44 = vadd.f32 -1.0, %v1855_v33  ;;  %v1857_v63 = vpop.eup %1856  ;;  %v781_v61 = vmul.f32 1.6732632, %v1682_v38  ;;  %v796_v25 = vsel %vm716_vm8, %v2480_v10, %v780_v9  ;;  %v2574_v10 = vmul.f32 1.050701, %v794_v47 }
 0x143   : > { %v782_v31 = vmul.f32 1.6732632, %v1683_v36  ;;  %v1859_v13 = vpop.eup %1858  ;;  %v1684_v32 = vadd.f32 -1.0, %v1857_v63  ;;  %v795_v19 = vsel %vm715_vm9, %v2484_v4, %v779_v41  ;;  %v2580_v4 = vmul.f32 1.050701, %v796_v25 }
 0x144   : > { %v784_v14 = vmul.f32 1.6732632, %v1685_v44  ;;  %v1861_v17 = vpop.eup %1860  ;;  %v797_v57 = vsel %vm717_vm10, %v2488_v16, %v781_v61  ;;  %v1686_v58 = vadd.f32 -1.0, %v1859_v13  ;;  %v2585_v1 = vmul.f32 1.050701, %v795_v19 }
 0x145   : > { %v1863_v60 = vpop.eup %1862  ;;  %v798_v15 = vsel %vm718_vm11, %v2492_v50, %v782_v31  ;;  %v783_v18 = vmul.f32 1.6732632, %v1684_v32  ;;  %v1687_v12 = vadd.f32 -1.0, %v1861_v17  ;;  %v2587_v2 = vmul.f32 1.050701, %v797_v57  ;;  %v851_v31 = vpop.permute.xlu0 %850 }
 0x146   : > { %v800_v16 = vsel %vm720_vm12, %v2496_v54, %v784_v14  ;;  %v1689_v51 = vadd.f32 -1.0, %v1863_v60  ;;  %v2589_v23 = vmul.f32 1.050701, %v798_v15  ;;  %v756_v50 = vmul.f32 1.442695, %v2570_v62  ;;  %v1865_v28 = vpop.eup %1864  ;;  %v846_v54 = vpop.permute.xlu1 %845 }
 0x147   : > { %v2595_v3 = vmul.f32 1.050701, %v800_v16  ;;  %v785_v30 = vmul.f32 1.6732632, %v1686_v58  ;;  %v799_v59 = vsel %vm719_vm13, %v2503_v35, %v783_v18  ;;  %v786_v20 = vmul.f32 1.6732632, %v1687_v12 }
 0x148   : > { %v788_v37 = vmul.f32 1.6732632, %v1689_v51  ;;  %v1688_v40 = vadd.f32 -1.0, %v1865_v28  ;;  %v2615_v63 = vmul.f32 1.050701, %v799_v59 }
 0x149   : > { %v801_v41 = vsel %vm721_vm14, %v2508_v46, %v785_v30  ;;  %v802_v61 = vsel %vm722_vm15, %v2513_v8, %v786_v20  ;;  %v2662_v30 = vpop.permute.xlu0 %1115 }
 0x14a   : > { %v804_v13 = vsel %vm724_vm0, %v2517_v49, %v788_v37  ;;  %v787_v32 = vmul.f32 1.6732632, %v1688_v40  ;;  %v2636_v25 = vpop.permute.xlu1 %855  ;;  %v2638_v60 = vmul.f32 1.050701, %v801_v41  ;;  %v2640_v19 = vmul.f32 1.050701, %v802_v61 }
 0x14b   : > { %v2644_v15 = vmul.f32 1.050701, %v804_v13 }
 0x1fa   : > { %v909_v22 = vpop.f32.mrb[16].mxu0 }
 0x1fb   : > { %v2593_v27 = vadd.f32 %v909_v22, %v841_v6  ;;  %v911_v56 = vpop.f32.mrb[17].mxu0 }
 0x1fc   : > { %v2598_v24 = vadd.f32 %v911_v56, %v841_v6  ;;  %v913_v52 = vpop.f32.mrb[18].mxu0  ;;  %v2654_v56 = vsel %vm723_vm1, %v2524_v55, %v787_v32 }
 0x1fd   : > { %v997_v33 = vmul.f32 1.442695, %v2593_v27  ;;  %v2604_v34 = vadd.f32 %v913_v52, %v846_v54  ;;  %v915_v5 = vpop.f32.mrb[19].mxu0  ;;  %vm981_vm2 = vcmp.gt.f32.partialorder %v2593_v27, 0.0 }
 0x1fe   : > { %v962_v11 = vpop.f32.mrb[16].mxu1  ;;  %v999_v38 = vmul.f32 1.442695, %v2598_v24  ;;  %v2610_v36 = vadd.f32 %v915_v5, %v846_v54  ;;  %vm982_vm3 = vcmp.gt.f32.partialorder %v2598_v24, 0.0  ;;  %v2674_v5 = vpop.permute.xlu1 %1120 }
 0x1ff   : > { %v2607_v39 = vadd.f32 %v962_v11, %v841_v6  ;;  %v964_v29 = vpop.f32.mrb[17].mxu1  ;;  %1866 = vpow2.f32 %v997_v33  ;;  %v1005_v43 = vmul.f32 1.442695, %v2604_v34  ;;  %vm985_vm4 = vcmp.gt.f32.partialorder %v2604_v34, 0.0 }
 0x200   : > { %v2612_v35 = vadd.f32 %v964_v29, %v841_v6  ;;  %v966_v44 = vpop.f32.mrb[18].mxu1  ;;  %1868 = vpow2.f32 %v999_v38  ;;  %v1007_v47 = vmul.f32 1.442695, %v2610_v36  ;;  %vm986_vm7 = vcmp.gt.f32.partialorder %v2610_v36, 0.0 }
 0x201   : > { %v1001_v9 = vmul.f32 1.442695, %v2607_v39  ;;  %v2618_v48 = vadd.f32 %v966_v44, %v846_v54  ;;  %v968_v42 = vpop.f32.mrb[19].mxu1  ;;  %1870 = vpow2.f32 %v1005_v43  ;;  %vm983_vm5 = vcmp.gt.f32.partialorder %v2607_v39, 0.0 }
 0x202   : > { %v1003_v0 = vmul.f32 1.442695, %v2612_v35  ;;  %v919_v14 = vpop.f32.mrb[20].mxu0  ;;  %v2632_v46 = vadd.f32 %v968_v42, %v846_v54  ;;  %vm984_vm6 = vcmp.gt.f32.partialorder %v2612_v35, 0.0 }
 0x203   : > { %1872 = vpow2.f32 %v1001_v9  ;;  %v1009_v45 = vmul.f32 1.442695, %v2618_v48  ;;  %v2634_v17 = vadd.f32 %v919_v14, %v851_v31  ;;  %v921_v8 = vpop.f32.mrb[21].mxu0  ;;  %vm987_vm8 = vcmp.gt.f32.partialorder %v2618_v48, 0.0 }
 0x204   : > { %1874 = vpow2.f32 %v1003_v0  ;;  %v2642_v49 = vadd.f32 %v921_v8, %v851_v31  ;;  %v923_v57 = vpop.f32.mrb[22].mxu0  ;;  %v1011_v58 = vmul.f32 1.442695, %v2632_v46  ;;  %vm988_vm9 = vcmp.gt.f32.partialorder %v2632_v46, 0.0 }
 0x205   : > { %1876 = vpow2.f32 %v1009_v45  ;;  %v925_v18 = vpop.f32.mrb[23].mxu0  ;;  %v1013_v12 = vmul.f32 1.442695, %v2634_v17  ;;  %v2660_v54 = vadd.f32 %v923_v57, %v2636_v25  ;;  %v2684_v45 = vpop.permute.xlu0 %1125  ;;  %vm989_vm10 = vcmp.gt.f32.partialorder %v2634_v17, 0.0 }
 0x206   : > { %1878 = vpow2.f32 %v1007_v47  ;;  %v972_v16 = vpop.f32.mrb[20].mxu1  ;;  %v1015_v51 = vmul.f32 1.442695, %v2642_v49  ;;  %v2678_v29 = vadd.f32 %v925_v18, %v2636_v25  ;;  %vm990_vm11 = vcmp.gt.f32.partialorder %v2642_v49, 0.0 }
 0x207   : > { %1880 = vpow2.f32 %v756_v50  ;;  %v2648_v6 = vadd.f32 %v972_v16, %v851_v31  ;;  %v974_v22 = vpop.f32.mrb[21].mxu1  ;;  %v1021_v38 = vmul.f32 1.442695, %v2660_v54 }
 0x208   : > { %v2657_v28 = vadd.f32 %v974_v22, %v851_v31  ;;  %v976_v50 = vpop.f32.mrb[22].mxu1  ;;  %1882 = vpow2.f32 %v1011_v58  ;;  %v1023_v8 = vmul.f32 1.442695, %v2678_v29  ;;  %v2695_v22 = vpop.permute.xlu1 %1130 }
 0x209   : > { %v1017_v52 = vmul.f32 1.442695, %v2648_v6  ;;  %v2667_v59 = vpop.f32.mrb[23].mxu1  ;;  %v1867_v55 = vpop.eup %1866  ;;  %1884 = vpow2.f32 %v1013_v12  ;;  %v2672_v33 = vadd.f32 %v976_v50, %v2636_v25  ;;  %vm991_vm12 = vcmp.gt.f32.partialorder %v2648_v6, 0.0 }
 0x20a   : > { %v1019_v20 = vmul.f32 1.442695, %v2657_v28  ;;  %v1869_v11 = vpop.eup %1868  ;;  %v1697_v37 = vadd.f32 -1.0, %v1867_v55  ;;  %1886 = vpow2.f32 %v1015_v51  ;;  %vm992_vm13 = vcmp.gt.f32.partialorder %v2657_v28, 0.0 }
 0x20b   : > { %v1871_v40 = vpop.eup %1870  ;;  %v1698_v43 = vadd.f32 -1.0, %v1869_v11  ;;  %1888 = vpow2.f32 %v1017_v52  ;;  %v1025_v31 = vmul.f32 1.442695, %v2672_v33 }
 0x20c   : > { %v1045_v9 = vmul.f32 1.6732632, %v1697_v37  ;;  %v1701_v42 = vadd.f32 -1.0, %v1871_v40  ;;  %1890 = vpow2.f32 %v1019_v20 }
 0x20d   : > { %v1873_v44 = vpop.eup %1872  ;;  %v1046_v0 = vmul.f32 1.6732632, %v1698_v43  ;;  %1892 = vpow2.f32 %v1021_v38 }
 0x20e   : > { %v1875_v41 = vpop.eup %1874  ;;  %v1699_v61 = vadd.f32 -1.0, %v1873_v44  ;;  %v1061_v47 = vsel %vm981_vm2, %v2593_v27, %v1045_v9  ;;  %v1049_v32 = vmul.f32 1.6732632, %v1701_v42  ;;  %1894 = vpow2.f32 %v1025_v31 }
 0x20f   : > { %v1877_v13 = vpop.eup %1876  ;;  %v1700_v14 = vadd.f32 -1.0, %v1875_v41  ;;  %v1077_v58 = vmul.f32 1.050701, %v1061_v47  ;;  %v1062_v18 = vsel %vm982_vm3, %v2598_v24, %v1046_v0  ;;  %v1156_v0 = vpop.permute.xlu0 %1155  ;;  %1896 = vpow2.f32 %v1023_v8 }
 0x210   : > { %v1879_v57 = vpop.eup %1878  ;;  %v1047_v16 = vmul.f32 1.6732632, %v1699_v61  ;;  %v1703_v12 = vadd.f32 -1.0, %v1877_v13  ;;  %v1078_v50 = vmul.f32 1.050701, %v1062_v18  ;;  %v1065_v27 = vsel %vm985_vm4, %v2604_v34, %v1049_v32 }
 0x211   : > { %v2693_v51 = vpop.eup %1880  ;;  %v1048_v52 = vmul.f32 1.6732632, %v1700_v14  ;;  %v1702_v55 = vadd.f32 -1.0, %v1879_v57  ;;  %v1093_v20 = vadd.f32 %v1077_v58, %v2552_v21  ;;  %v1081_v37 = vmul.f32 1.050701, %v1065_v27  ;;  %v2723_v58 = vpop.permute.xlu1 %1160 }
 0x212   : > { %v1063_v11 = vsel %vm983_vm5, %v2607_v39, %v1047_v16  ;;  %v1051_v24 = vmul.f32 1.6732632, %v1703_v12  ;;  %v1883_v38 = vpop.eup %1882  ;;  %v1094_v43 = vadd.f32 %v1078_v50, %v2560_v26 }
 0x213   : > { %v1079_v40 = vmul.f32 1.050701, %v1063_v11  ;;  %v1064_v44 = vsel %vm984_vm6, %v2612_v35, %v1048_v52  ;;  %v1050_v9 = vmul.f32 1.6732632, %v1702_v55  ;;  %v1885_v42 = vpop.eup %1884  ;;  %v1133_v34 = vmul.f32 %v2662_v30, %v1093_v20 }
 0x214   : > { %v1080_v41 = vmul.f32 1.050701, %v1064_v44  ;;  %v1097_v21 = vadd.f32 %v1081_v37, %v2574_v10  ;;  %v1067_v39 = vsel %vm987_vm8, %v2618_v48, %v1051_v24  ;;  %v1887_v61 = vpop.eup %1886  ;;  %v1134_v26 = vmul.f32 %v2662_v30, %v1094_v43 }
 0x215   : > { %v1095_v13 = vadd.f32 %v1079_v40, %v2554_v53  ;;  %v1083_v47 = vmul.f32 1.050701, %v1067_v39  ;;  %v1066_v35 = vsel %vm986_vm7, %v2610_v36, %v1050_v9  ;;  %v1889_v14 = vpop.eup %1888  ;;  %v2718_v32 = vadd.f32 %v1156_v0, %v1133_v34 }
 0x216   : > { %v1096_v10 = vadd.f32 %v1080_v41, %v2572_v7  ;;  %v1137_v57 = vmul.f32 %v2674_v5, %v1097_v21  ;;  %v1891_v48 = vpop.eup %1890  ;;  %v2726_v16 = vadd.f32 %v1156_v0, %v1134_v26  ;;  %v1082_v31 = vmul.f32 1.050701, %v1066_v35 }
 0x217   : > { %v1135_v53 = vmul.f32 %v2662_v30, %v1095_v13  ;;  %v1099_v18 = vadd.f32 %v1083_v47, %v2580_v4  ;;  %v2729_v36 = vpop.eup %1892  ;;  %v1205_v12 = vmul.f32 1.442695, %v2718_v32  ;;  %v1704_v20 = vadd.f32 -1.0, %v1883_v38 }
 0x218   : > { %v1136_v7 = vmul.f32 %v2662_v30, %v1096_v10  ;;  %v2734_v50 = vadd.f32 %v2723_v58, %v1137_v57  ;;  %v1207_v27 = vmul.f32 1.442695, %v2726_v16  ;;  %v1098_v24 = vadd.f32 %v1082_v31, %v2585_v1  ;;  %v2758_v21 = vpop.eup %1894 }
 0x219   : > { %v2736_v52 = vadd.f32 %v1156_v0, %v1135_v53  ;;  %v1139_v55 = vmul.f32 %v2674_v5, %v1099_v18  ;;  %1898 = vpow2.f32 %v1205_v12  ;;  %v1052_v40 = vmul.f32 1.6732632, %v1704_v20  ;;  %v2763_v47 = vpop.eup %1896 }
 0x21a   : > { %v2740_v4 = vadd.f32 %v1156_v0, %v1136_v7  ;;  %v1213_v8 = vmul.f32 1.442695, %v2734_v50  ;;  %1900 = vpow2.f32 %v1207_v27  ;;  %v1138_v43 = vmul.f32 %v2674_v5, %v1098_v24 }
 0x21b   : > { %v1209_v30 = vmul.f32 1.442695, %v2736_v52  ;;  %v2746_v11 = vadd.f32 %v2723_v58, %v1139_v55  ;;  %v1705_v44 = vadd.f32 -1.0, %v1885_v42  ;;  %v1707_v9 = vadd.f32 -1.0, %v1889_v14 }
 0x21c   : > { %v1211_v37 = vmul.f32 1.442695, %v2740_v4  ;;  %1902 = vpow2.f32 %v1213_v8  ;;  %v1068_v34 = vsel %vm988_vm9, %v2632_v46, %v1052_v40  ;;  %v1706_v41 = vadd.f32 -1.0, %v1887_v61  ;;  %v2800_v40 = vpop.permute.xlu0 %1165 }
 0x21d   : > { %1904 = vpow2.f32 %v1209_v30  ;;  %v1217_v38 = vmul.f32 1.442695, %v2746_v11  ;;  %v1708_v1 = vadd.f32 -1.0, %v1891_v48  ;;  %v2761_v39 = vadd.f32 %v2723_v58, %v1138_v43 }
 0x21e   : > { %1906 = vpow2.f32 %v1211_v37  ;;  %v1084_v0 = vmul.f32 1.050701, %v1068_v34  ;;  %v1053_v13 = vmul.f32 1.6732632, %v1705_v44  ;;  %v1055_v26 = vmul.f32 1.6732632, %v1707_v9 }
 0x21f   : > { %1908 = vpow2.f32 %v1217_v38  ;;  %vm1189_vm14 = vcmp.gt.f32.partialorder %v2718_v32, 0.0  ;;  %vm1190_vm15 = vcmp.gt.f32.partialorder %v2726_v16, 0.0  ;;  %v1054_v42 = vmul.f32 1.6732632, %v1706_v41 }
 0x220   : > { %v1056_v35 = vmul.f32 1.6732632, %v1708_v1  ;;  %vm1193_vm0 = vcmp.gt.f32.partialorder %v2734_v50, 0.0  ;;  %v1215_v46 = vmul.f32 1.442695, %v2761_v39  ;;  %v1100_v61 = vadd.f32 %v1084_v0, %v2587_v2 }
 0x221   : > { %v1069_v14 = vsel %vm989_vm10, %v2634_v17, %v1053_v13  ;;  %vm1191_vm1 = vcmp.gt.f32.partialorder %v2736_v52, 0.0  ;;  %v1071_v57 = vsel %vm991_vm12, %v2648_v6, %v1055_v26  ;;  %v1070_v48 = vsel %vm990_vm11, %v2642_v49, %v1054_v42 }
 0x222   : > { %v1085_v10 = vmul.f32 1.050701, %v1069_v14  ;;  %v1072_v53 = vsel %vm992_vm13, %v2657_v28, %v1056_v35  ;;  %vm1192_vm2 = vcmp.gt.f32.partialorder %v2740_v4, 0.0  ;;  %1910 = vpow2.f32 %v1215_v46 }
 0x223   : > { %v1899_v2 = vpop.eup %1898  ;;  %v1140_v17 = vmul.f32 %v2674_v5, %v1100_v61  ;;  %v1087_v18 = vmul.f32 1.050701, %v1071_v57  ;;  %v1086_v12 = vmul.f32 1.050701, %v1070_v48  ;;  %vm1195_vm3 = vcmp.gt.f32.partialorder %v2746_v11, 0.0 }
 0x224   : > { %v1901_v7 = vpop.eup %1900  ;;  %v1713_v31 = vadd.f32 -1.0, %v1899_v2  ;;  %v1101_v6 = vadd.f32 %v1085_v10, %v2589_v23  ;;  %v1088_v27 = vmul.f32 1.050701, %v1072_v53  ;;  %vm1194_vm4 = vcmp.gt.f32.partialorder %v2761_v39, 0.0 }
 0x225   : > { %v1714_v55 = vadd.f32 -1.0, %v1901_v7  ;;  %v2788_v20 = vadd.f32 %v2723_v58, %v1140_v17  ;;  %v2791_v28 = vadd.f32 %v1087_v18, %v2595_v3  ;;  %v2794_v8 = vadd.f32 %v1086_v12, %v2615_v63 }
 0x226   : > { %v1903_v49 = vpop.eup %1902  ;;  %v1253_v30 = vmul.f32 1.6732632, %v1713_v31  ;;  %v1141_v24 = vmul.f32 %v2684_v45, %v1101_v6  ;;  %v2798_v38 = vadd.f32 %v1088_v27, %v2638_v60  ;;  %v1709_v3 = vadd.f32 -1.0, %v2729_v36 }
 0x227   : > { %v1905_v5 = vpop.eup %1904  ;;  %v1717_v37 = vadd.f32 -1.0, %v1903_v49  ;;  %v1254_v58 = vmul.f32 1.6732632, %v1714_v55  ;;  %v1219_v44 = vmul.f32 1.442695, %v2788_v20  ;;  %vm1196_vm5 = vcmp.gt.f32.partialorder %v2788_v20, 0.0 }
 0x228   : > { %v1907_v23 = vpop.eup %1906  ;;  %v1715_v43 = vadd.f32 -1.0, %v1905_v5  ;;  %v1269_v63 = vsel %vm1189_vm14, %v2718_v32, %v1253_v30  ;;  %v2808_v1 = vadd.f32 %v2800_v40, %v1141_v24  ;;  %vm993_vm7 = vcmp.gt.f32.partialorder %v2660_v54, 0.0 }
 0x229   : > { %v1909_v9 = vpop.eup %1908  ;;  %v1716_v34 = vadd.f32 -1.0, %v1907_v23  ;;  %v1257_v41 = vmul.f32 1.6732632, %v1717_v37  ;;  %v2810_v60 = vmul.f32 1.050701, %v1269_v63  ;;  %v1270_v13 = vsel %vm1190_vm15, %v2726_v16, %v1254_v58 }
 0x22a   : > { %v1255_v0 = vmul.f32 1.6732632, %v1715_v43  ;;  %v1719_v26 = vadd.f32 -1.0, %v1909_v9  ;;  %v2815_v42 = vmul.f32 1.050701, %v1270_v13  ;;  %1912 = vpow2.f32 %v1219_v44 }
 0x22b   : > { %v1256_v36 = vmul.f32 1.6732632, %v1716_v34  ;;  %v1273_v32 = vsel %vm1193_vm0, %v2734_v50, %v1257_v41  ;;  %v1301_v35 = vmul.f32 %v2810_v60, %v2810_v60  ;;  %v1221_v27 = vmul.f32 1.442695, %v2808_v1 }
 0x22c   : > { %v1271_v46 = vsel %vm1191_vm1, %v2736_v52, %v1255_v0  ;;  %v2825_v61 = vmul.f32 1.050701, %v1273_v32  ;;  %v1259_v14 = vmul.f32 1.6732632, %v1719_v26  ;;  %v1302_v10 = vmul.f32 %v2815_v42, %v2815_v42  ;;  %v1911_v57 = vpop.eup %1910 }
 0x22d   : > { %v2827_v16 = vmul.f32 1.050701, %v1271_v46  ;;  %v1272_v50 = vsel %vm1192_vm2, %v2740_v4, %v1256_v36  ;;  %v1317_v48 = vrot.slane %v1301_v35, 4  ;;  %v1718_v4 = vadd.f32 -1.0, %v1911_v57 }
 0x22e   : > { %v2835_v53 = vmul.f32 1.050701, %v1272_v50  ;;  %v1305_v52 = vmul.f32 %v2825_v61, %v2825_v61  ;;  %v1275_v2 = vsel %vm1195_vm3, %v2746_v11, %v1259_v14  ;;  %v1323_v18 = vrot.slane %v1302_v10, 4 }
 0x22f   : > { %v1303_v17 = vmul.f32 %v2827_v16, %v2827_v16  ;;  %v2844_v12 = vmul.f32 1.050701, %v1275_v2  ;;  %v1318_v7 = vadd.f32 %v1317_v48, %v1301_v35  ;;  %v1258_v11 = vmul.f32 1.6732632, %v1718_v4 }
 0x230   : > { %v1304_v31 = vmul.f32 %v2835_v53, %v2835_v53  ;;  %v1373_v6 = vrot.slane %v1305_v52, 4  ;;  %v1324_v55 = vadd.f32 %v1323_v18, %v1302_v10  ;;  %1914 = vpow2.f32 %v1221_v27 }
 0x231   : > { %v1329_v49 = vrot.slane %v1303_v17, 4  ;;  %v1307_v5 = vmul.f32 %v2844_v12, %v2844_v12  ;;  %v1319_v30 = vrot.slane %v1318_v7, 2  ;;  %v1274_v44 = vsel %vm1194_vm4, %v2761_v39, %v1258_v11 }
 0x232   : > { %v1335_v37 = vrot.slane %v1304_v31, 4  ;;  %v1374_v24 = vadd.f32 %v1373_v6, %v1305_v52  ;;  %v1325_v43 = vrot.slane %v1324_v55, 2  ;;  %v2854_v41 = vmul.f32 1.050701, %v1274_v44 }
 0x233   : > { %v1330_v23 = vadd.f32 %v1329_v49, %v1303_v17  ;;  %v1385_v58 = vrot.slane %v1307_v5, 4  ;;  %v1320_v9 = vadd.f32 %v1319_v30, %v1318_v7  ;;  %v2856_v32 = vmul.f32 1.6732632, %v1709_v3 }
 0x234   : > { %v1336_v63 = vadd.f32 %v1335_v37, %v1304_v31  ;;  %v1375_v34 = vrot.slane %v1374_v24, 2  ;;  %v1913_v0 = vpop.eup %1912  ;;  %v1326_v26 = vadd.f32 %v1325_v43, %v1324_v55  ;;  %v1306_v10 = vmul.f32 %v2854_v41, %v2854_v41 }
 0x235   : > { %v1331_v13 = vrot.slane %v1330_v23, 2  ;;  %v1386_v36 = vadd.f32 %v1385_v58, %v1307_v5  ;;  %v1321_v35 = vrot.slane %v1320_v9, 1  ;;  %v1720_v48 = vadd.f32 -1.0, %v1913_v0 }
 0x236   : > { %v1337_v46 = vrot.slane %v1336_v63, 2  ;;  %v1376_v14 = vadd.f32 %v1375_v34, %v1374_v24  ;;  %v1327_v50 = vrot.slane %v1326_v26, 1  ;;  %v1143_v3 = vmul.f32 %v2684_v45, %v2791_v28 }
 0x237   : > { %v1332_v39 = vadd.f32 %v1331_v13, %v1330_v23  ;;  %v1387_v57 = vrot.slane %v1386_v36, 2  ;;  %v2861_v52 = vadd.f32 %v1321_v35, %v1320_v9  ;;  %v1379_v31 = vrot.slane %v1306_v10, 4 }
 0x238   : > { %v1338_v2 = vadd.f32 %v1337_v46, %v1336_v63  ;;  %v1377_v17 = vrot.slane %v1376_v14, 1  ;;  %v2865_v4 = vadd.f32 %v1327_v50, %v1326_v26  ;;  %v1260_v37 = vmul.f32 1.6732632, %v1720_v48 }
 0x239   : > { %v1333_v18 = vrot.slane %v1332_v39, 1  ;;  %v1388_v7 = vadd.f32 %v1387_v57, %v1386_v36  ;;  %v1341_v6 = vadd.f32 1.0, %v2861_v52  ;;  %v1353_v27 = vadd.f32 1e-08, %v2861_v52 }
 0x23a   : > { %v1339_v49 = vrot.slane %v1338_v2, 1  ;;  %v2869_v55 = vadd.f32 %v1377_v17, %v1376_v14  ;;  %v1342_v11 = vadd.f32 1.0, %v2865_v4  ;;  %vm1197_vm6 = vcmp.gt.f32.partialorder %v2808_v1, 0.0  ;;  %v1915_v28 = vpop.eup %1914 }
 0x23b   : > { %v2871_v5 = vadd.f32 %v1333_v18, %v1332_v39  ;;  %v1389_v30 = vrot.slane %v1388_v7, 1  ;;  %1916 = vrcp.f32 %v1341_v6  ;;  %v1354_v24 = vadd.f32 1e-08, %v2865_v4 }
 0x23c   : > { %v2876_v23 = vadd.f32 %v1339_v49, %v1338_v2  ;;  %v1397_v43 = vadd.f32 1.0, %v2869_v55  ;;  %1918 = vrsqrt.f32 %v1353_v27  ;;  %v1409_v34 = vadd.f32 1e-08, %v2869_v55 }
 0x23d   : > { %v1343_v58 = vadd.f32 1.0, %v2871_v5  ;;  %v1355_v44 = vadd.f32 1e-08, %v2871_v5  ;;  %v2881_v9 = vadd.f32 %v1389_v30, %v1388_v7  ;;  %1920 = vrcp.f32 %v1342_v11 }
 0x23e   : > { %v1344_v63 = vadd.f32 1.0, %v2876_v23  ;;  %v1380_v0 = vadd.f32 %v1379_v31, %v1306_v10  ;;  %v1356_v13 = vadd.f32 1e-08, %v2876_v23  ;;  %v1276_v36 = vsel %vm1196_vm5, %v2788_v20, %v1260_v37 }
 0x23f   : > { %1922 = vrcp.f32 %v1343_v58  ;;  %v1399_v26 = vadd.f32 1.0, %v2881_v9  ;;  %v2891_v46 = vmul.f32 1.050701, %v1276_v36  ;;  %v1721_v14 = vadd.f32 -1.0, %v1915_v28 }
 0x240   : > { %1924 = vrsqrt.f32 %v1355_v44  ;;  %v1381_v35 = vrot.slane %v1380_v0, 2  ;;  %v2894_v10 = vadd.f32 %v2800_v40, %v1143_v3  ;;  %v1142_v39 = vmul.f32 %v2684_v45, %v2794_v8 }
 0x241   : > { %1926 = vrsqrt.f32 %v1354_v24  ;;  %v1144_v50 = vmul.f32 %v2684_v45, %v2798_v38  ;;  %v1308_v20 = vmul.f32 %v2891_v46, %v2891_v46  ;;  %v1261_v48 = vmul.f32 1.6732632, %v1721_v14 }
 0x242   : > { %1928 = vrcp.f32 %v1344_v63  ;;  %v1382_v57 = vadd.f32 %v1381_v35, %v1380_v0  ;;  %v1411_v2 = vadd.f32 1e-08, %v2881_v9  ;;  %v1225_v17 = vmul.f32 1.442695, %v2894_v10 }
 0x243   : > { %1930 = vrsqrt.f32 %v1356_v13  ;;  %v2905_v3 = vadd.f32 %v2800_v40, %v1142_v39  ;;  %v1391_v18 = vrot.slane %v1308_v20, 4  ;;  %v1277_v45 = vsel %vm1197_vm6, %v2808_v1, %v1261_v48 }
 0x244   : > { %1932 = vrcp.f32 %v1397_v43  ;;  %v1383_v8 = vrot.slane %v1382_v57, 1  ;;  %v2911_v38 = vmul.f32 1.050701, %v1277_v45  ;;  %v1711_v31 = vadd.f32 -1.0, %v2758_v21 }
 0x245   : > { %1934 = vrsqrt.f32 %v1409_v34  ;;  %v1223_v7 = vmul.f32 1.442695, %v2905_v3  ;;  %v1917_v6 = vpop.eup %1916  ;;  %v1392_v49 = vadd.f32 %v1391_v18, %v1308_v20  ;;  %v2918_v11 = vadd.f32 %v2800_v40, %v1144_v50 }
 0x246   : > { %1936 = vrcp.f32 %v1399_v26  ;;  %v2915_v27 = vadd.f32 %v1383_v8, %v1382_v57  ;;  %vm995_vm8 = vcmp.gt.f32.partialorder %v2672_v33, 0.0  ;;  %v1919_v30 = vpop.eup %1918  ;;  %v1346_v1 = vmul.f32 %v1917_v6, %v2861_v52 }
 0x247   : > { %1938 = vrsqrt.f32 %v1411_v2  ;;  %v1309_v21 = vmul.f32 %v2911_v38, %v2911_v38  ;;  %v1073_v37 = vsel %vm993_vm7, %v2660_v54, %v2856_v32  ;;  %v1921_v28 = vpop.eup %1920  ;;  %v1393_v43 = vrot.slane %v1392_v49, 2 }
 0x248   : > { %v1398_v40 = vadd.f32 1.0, %v2915_v27  ;;  %v1410_v24 = vadd.f32 1e-08, %v2915_v27  ;;  %1940 = vpow2.f32 %v1225_v17  ;;  %v1361_v44 = vmul.f32 %v1919_v30, %v1346_v1  ;;  %v2961_v1 = vpop.permute.xlu1 %1170 }
 0x249   : > { %v1923_v58 = vpop.eup %1922  ;;  %v1348_v52 = vmul.f32 %v1921_v28, %v2865_v4  ;;  %v1429_v63 = vrot.slane %v1309_v21, 4  ;;  %1942 = vpow2.f32 %v1223_v7  ;;  %v1394_v13 = vadd.f32 %v1393_v43, %v1392_v49 }
 0x24a   : > { %v1925_v34 = vpop.eup %1924  ;;  %v1350_v0 = vmul.f32 %v1923_v58, %v2871_v5  ;;  %1944 = vrcp.f32 %v1398_v40  ;;  %v2938_v54 = vadd.f32 %v2667_v59, %v2636_v25  ;;  %v1365_v26 = vmul.f32 %v1361_v44, %v2810_v60 }
 0x24b   : > { %v1927_v32 = vpop.eup %1926  ;;  %1946 = vrsqrt.f32 %v1410_v24  ;;  %v1430_v36 = vadd.f32 %v1429_v63, %v1309_v21  ;;  %v1227_v35 = vmul.f32 1.442695, %v2918_v11  ;;  %v1395_v50 = vrot.slane %v1394_v13, 1 }
 0x24c   : > { %v1929_v4 = vpop.eup %1928  ;;  %v1363_v14 = vmul.f32 %v1925_v34, %v1350_v0  ;;  %v1362_v39 = vmul.f32 %v1927_v32, %v1348_v52  ;;  %v1089_v57 = vmul.f32 1.050701, %v1073_v37  ;;  %1369 = vst [vmem:[%s2943_s22] sm:$0xff] %v1365_v26  ;;  %v1059_v60 = vmul.f32 1.6732632, %v1711_v31 }
 0x24d   : > { %v1931_v20 = vpop.eup %1930  ;;  %v1352_v25 = vmul.f32 %v1929_v4, %v2876_v23  ;;  %v1431_v59 = vrot.slane %v1430_v36, 2  ;;  %1948 = vpow2.f32 %v1227_v35  ;;  %v2949_v17 = vadd.f32 %v1395_v50, %v1394_v13 }
 0x24e   : > { %v1933_v5 = vpop.eup %1932  ;;  %v1367_v48 = vmul.f32 %v1363_v14, %v2827_v16  ;;  %v1366_v2 = vmul.f32 %v1362_v39, %v2815_v42  ;;  %v1105_v8 = vadd.f32 %v1089_v57, %v2640_v19  ;;  %v1075_v23 = vsel %vm995_vm8, %v2672_v33, %v1059_v60 }
 0x24f   : > { %v1935_v18 = vpop.eup %1934  ;;  %v1364_v45 = vmul.f32 %v1931_v20, %v1352_v25  ;;  %v1402_v7 = vmul.f32 %v1933_v5, %v2869_v55  ;;  %v1432_v6 = vadd.f32 %v1431_v59, %v1430_v36  ;;  %v1400_v16 = vadd.f32 1.0, %v2949_v17 }
 0x250   : > { %v1937_v49 = vpop.eup %1936  ;;  %1371 = vst [vmem:[%s2943_s22 + $0x10] sm:$0xff] %v1367_v48  ;;  %1370 = vst [vmem:[%s2943_s22 + $0x8] sm:$0xff] %v1366_v2  ;;  %v1412_v42 = vadd.f32 1e-08, %v2949_v17  ;;  %v1145_v31 = vmul.f32 %v2695_v22, %v1105_v8  ;;  %v1091_v19 = vmul.f32 1.050701, %v1075_v23 }
 0x251   : > { %v1939_v30 = vpop.eup %1938  ;;  %v1368_v55 = vmul.f32 %v1364_v45, %v2835_v53  ;;  %v1417_v21 = vmul.f32 %v1935_v18, %v1402_v7  ;;  %v1406_v37 = vmul.f32 %v1937_v49, %v2881_v9  ;;  %v1433_v33 = vrot.slane %v1432_v6, 1 }
 0x252   : > { %vm994_vm9 = vcmp.gt.f32.partialorder %v2678_v29, 0.0  ;;  %v1941_v28 = vpop.eup %1940  ;;  %1950 = vrcp.f32 %v1400_v16  ;;  %vm1199_vm10 = vcmp.gt.f32.partialorder %v2894_v10, 0.0  ;;  %v2968_v40 = vadd.f32 %v2961_v1, %v1145_v31 }
 0x253   : > { %v1107_v24 = vadd.f32 %v1091_v19, %v2644_v15  ;;  %v1943_v43 = vpop.eup %1942  ;;  %1372 = vst [vmem:[%s2943_s22 + $0x18] sm:$0xff] %v1368_v55  ;;  %v1421_v53 = vmul.f32 %v1417_v21, %v2825_v61  ;;  %v1419_v58 = vmul.f32 %v1939_v30, %v1406_v37  ;;  %v2973_v44 = vadd.f32 %v1433_v33, %v1432_v6 }
 0x254   : > { %v1710_v9 = vadd.f32 -1.0, %v2763_v47  ;;  %v1945_v52 = vpop.eup %1944  ;;  %1952 = vrsqrt.f32 %v1412_v42  ;;  %v1723_v63 = vadd.f32 -1.0, %v1941_v28  ;;  %v1722_v34 = vadd.f32 -1.0, %v1943_v43 }
 0x255   : > { %v1229_v0 = vmul.f32 1.442695, %v2968_v40  ;;  %v1947_v13 = vpop.eup %1946  ;;  %1425 = vst [vmem:[%s2943_s22 + $0x20] sm:$0xff] %v1421_v53  ;;  %v1423_v15 = vmul.f32 %v1419_v58, %v2844_v12  ;;  %v1404_v32 = vmul.f32 %v1945_v52, %v2915_v27  ;;  %v1453_v61 = vadd.f32 1.0, %v2973_v44 }
 0x256   : > { %v1465_v26 = vadd.f32 1e-08, %v2973_v44  ;;  %v1263_v36 = vmul.f32 1.6732632, %v1723_v63  ;;  %v1262_v35 = vmul.f32 1.6732632, %v1722_v34  ;;  %v1147_v47 = vmul.f32 %v2695_v22, %v1107_v24 }
 0x257   : > { %1954 = vpow2.f32 %v1229_v0  ;;  %v1949_v4 = vpop.eup %1948  ;;  %1427 = vst [vmem:[%s2943_s22 + $0x30] sm:$0xff] %v1423_v15  ;;  %v1418_v14 = vmul.f32 %v1947_v13, %v1404_v32  ;;  %vm1198_vm11 = vcmp.gt.f32.partialorder %v2905_v3, 0.0  ;;  %v1058_v39 = vmul.f32 1.6732632, %v1710_v9 }
 0x258   : > { %1956 = vrcp.f32 %v1453_v61  ;;  %v1279_v12 = vsel %vm1199_vm10, %v2894_v10, %v1263_v36  ;;  %v1278_v27 = vsel %vm1198_vm11, %v2905_v3, %v1262_v35  ;;  %v1724_v50 = vadd.f32 -1.0, %v1949_v4 }
 0x259   : > { %1958 = vrsqrt.f32 %v1465_v26  ;;  %v1422_v57 = vmul.f32 %v1418_v14, %v2854_v41  ;;  %v2990_v20 = vmul.f32 1.050701, %v1279_v12  ;;  %v2992_v25 = vmul.f32 1.050701, %v1278_v27 }
 0x25a   : > { %v2995_v59 = vadd.f32 %v2961_v1, %v1147_v47  ;;  %v1264_v60 = vmul.f32 1.6732632, %v1724_v50  ;;  %v1074_v5 = vsel %vm994_vm9, %v2678_v29, %v1058_v39  ;;  %v1027_v48 = vmul.f32 1.442695, %v2938_v54 }
 0x25b   : > { %1426 = vst [vmem:[%s2943_s22 + $0x28] sm:$0xff] %v1422_v57  ;;  %v1311_v10 = vmul.f32 %v2990_v20, %v2990_v20  ;;  %v1310_v41 = vmul.f32 %v2992_v25, %v2992_v25  ;;  %vm1200_vm12 = vcmp.gt.f32.partialorder %v2918_v11, 0.0  ;;  %v819_v8 = vmul.f32 1.050701, %v2654_v56 }
 0x25c   : > { %v1233_v3 = vmul.f32 1.442695, %v2995_v59  ;;  %v1951_v2 = vpop.eup %1950  ;;  %v1280_v18 = vsel %vm1200_vm12, %v2918_v11, %v1264_v60  ;;  %v1090_v45 = vmul.f32 1.050701, %v1074_v5  ;;  %1960 = vpow2.f32 %v1027_v48 }
 0x25d   : > { %v1408_v29 = vmul.f32 %v1951_v2, %v2949_v17  ;;  %v1441_v7 = vrot.slane %v1311_v10, 4  ;;  %v1435_v6 = vrot.slane %v1310_v41, 4  ;;  %v3011_v23 = vmul.f32 1.050701, %v1280_v18 }
 0x25e   : > { %v1953_v49 = vpop.eup %1952  ;;  %1962 = vpow2.f32 %v1233_v3  ;;  %v1106_v16 = vadd.f32 %v1090_v45, %v819_v8  ;;  %v1690_v24 = vadd.f32 -1.0, %v2693_v51  ;;  %vm1201_vm13 = vcmp.gt.f32.partialorder %v2968_v40, 0.0 }
 0x25f   : > { %v1420_v42 = vmul.f32 %v1953_v49, %v1408_v29  ;;  %v1442_v31 = vadd.f32 %v1441_v7, %v1311_v10  ;;  %v1436_v19 = vadd.f32 %v1435_v6, %v1310_v41  ;;  %v1312_v56 = vmul.f32 %v3011_v23, %v3011_v23 }
 0x260   : > { %v1146_v11 = vmul.f32 %v2695_v22, %v1106_v16  ;;  %vm725_vm14 = vcmp.gt.f32.partialorder %v2570_v62, 0.0  ;;  %vm996_vm15 = vcmp.gt.f32.partialorder %v2938_v54, 0.0  ;;  %vm1203_vm0 = vcmp.gt.f32.partialorder %v2995_v59, 0.0 }
 0x261   : > { %v1955_v30 = vpop.eup %1954  ;;  %v1424_v17 = vmul.f32 %v1420_v42, %v2891_v46  ;;  %v1443_v21 = vrot.slane %v1442_v31, 2  ;;  %v1437_v37 = vrot.slane %v1436_v19, 2  ;;  %v1447_v33 = vrot.slane %v1312_v56, 4 }
 0x262   : > { %v1957_v55 = vpop.eup %1956  ;;  %v1725_v53 = vadd.f32 -1.0, %v1955_v30  ;;  %v3020_v58 = vadd.f32 %v2961_v1, %v1146_v11 }
 0x263   : > { %v1959_v28 = vpop.eup %1958  ;;  %v1458_v43 = vmul.f32 %v1957_v55, %v2973_v44  ;;  %1428 = vst [vmem:[%s2943_s22 + $0x38] sm:$0xff] %v1424_v17  ;;  %v1444_v9 = vadd.f32 %v1443_v21, %v1442_v31  ;;  %v1438_v52 = vadd.f32 %v1437_v37, %v1436_v19  ;;  %v1448_v63 = vadd.f32 %v1447_v33, %v1312_v56 }
 0x264   : > { %v1265_v0 = vmul.f32 1.6732632, %v1725_v53  ;;  %v1231_v46 = vmul.f32 1.442695, %v3020_v58  ;;  %v789_v44 = vmul.f32 1.6732632, %v1690_v24 }
 0x265   : > { %v1473_v34 = vmul.f32 %v1959_v28, %v1458_v43  ;;  %v1445_v13 = vrot.slane %v1444_v9, 1  ;;  %v1439_v15 = vrot.slane %v1438_v52, 1  ;;  %v1449_v32 = vrot.slane %v1448_v63, 2 }
 0x266   : > { %v1961_v51 = vpop.eup %1960  ;;  %v1281_v26 = vsel %vm1201_vm13, %v2968_v40, %v1265_v0  ;;  %1964 = vpow2.f32 %v1231_v46  ;;  %v805_v5 = vsel %vm725_vm14, %v2570_v62, %v789_v44  ;;  %vm1202_vm1 = vcmp.gt.f32.partialorder %v3020_v58, 0.0 }
 0x267   : > { %v1477_v61 = vmul.f32 %v1473_v34, %v2911_v38  ;;  %v1446_v36 = vadd.f32 %v1445_v13, %v1444_v9  ;;  %v1440_v35 = vadd.f32 %v1439_v15, %v1438_v52  ;;  %v1450_v47 = vadd.f32 %v1449_v32, %v1448_v63 }
 0x268   : > { %v3027_v4 = vmul.f32 1.050701, %v1281_v26  ;;  %v1963_v14 = vpop.eup %1962  ;;  %v1712_v39 = vadd.f32 -1.0, %v1961_v51  ;;  %v821_v29 = vmul.f32 1.050701, %v805_v5 }
 0x269   : > { %1481 = vst [vmem:[%s2943_s22 + $0x40] sm:$0xff] %v1477_v61  ;;  %v1455_v12 = vadd.f32 1.0, %v1446_v36  ;;  %v1467_v27 = vadd.f32 1e-08, %v1446_v36  ;;  %v1454_v50 = vadd.f32 1.0, %v1440_v35  ;;  %v1451_v57 = vrot.slane %v1450_v47, 1 }
 0x26a   : > { %v1313_v38 = vmul.f32 %v3027_v4, %v3027_v4  ;;  %v1727_v60 = vadd.f32 -1.0, %v1963_v14  ;;  %v1060_v40 = vmul.f32 1.6732632, %v1712_v39  ;;  %v1466_v48 = vadd.f32 1e-08, %v1440_v35 }
 0x26b   : > { %1966 = vrcp.f32 %v1455_v12  ;;  %v1452_v10 = vadd.f32 %v1451_v57, %v1450_v47 }
 0x26c   : > { %1968 = vrsqrt.f32 %v1467_v27  ;;  %v1485_v41 = vrot.slane %v1313_v38, 4  ;;  %v1267_v3 = vmul.f32 1.6732632, %v1727_v60  ;;  %v1076_v2 = vsel %vm996_vm15, %v2938_v54, %v1060_v40 }
 0x26d   : > { %1970 = vrcp.f32 %v1454_v50  ;;  %v1456_v8 = vadd.f32 1.0, %v1452_v10  ;;  %v1468_v18 = vadd.f32 1e-08, %v1452_v10  ;;  %v1092_v7 = vmul.f32 1.050701, %v1076_v2 }
 0x26e   : > { %v1486_v45 = vadd.f32 %v1485_v41, %v1313_v38  ;;  %1972 = vrsqrt.f32 %v1466_v48  ;;  %v1283_v62 = vsel %vm1203_vm0, %v2995_v59, %v1267_v3 }
 0x26f   : > { %1974 = vrcp.f32 %v1456_v8  ;;  %v3038_v16 = vmul.f32 1.050701, %v1283_v62  ;;  %v1108_v31 = vadd.f32 %v1092_v7, %v821_v29 }
 0x270   : > { %v1965_v6 = vpop.eup %1964  ;;  %v1487_v49 = vrot.slane %v1486_v45, 2  ;;  %1976 = vrsqrt.f32 %v1468_v18 }
 0x271   : > { %v1726_v42 = vadd.f32 -1.0, %v1965_v6  ;;  %v1315_v54 = vmul.f32 %v3038_v16, %v3038_v16  ;;  %v1148_v30 = vmul.f32 %v2695_v22, %v1108_v31 }
 0x272   : > { %v1488_v19 = vadd.f32 %v1487_v49, %v1486_v45 }
 0x273   : > { %v1266_v56 = vmul.f32 1.6732632, %v1726_v42  ;;  %v1497_v55 = vrot.slane %v1315_v54, 4  ;;  %v1188_v21 = vadd.f32 %v2961_v1, %v1148_v30 }
 0x274   : > { %v1489_v11 = vrot.slane %v1488_v19, 1 }
 0x275   : > { %v1967_v59 = vpop.eup %1966  ;;  %v1282_v17 = vsel %vm1202_vm1, %v3020_v58, %v1266_v56  ;;  %v1498_v24 = vadd.f32 %v1497_v55, %v1315_v54  ;;  %v1235_v9 = vmul.f32 1.442695, %v1188_v21  ;;  %vm1204_vm2 = vcmp.gt.f32.partialorder %v1188_v21, 0.0 }
 0x276   : > { %v1969_v37 = vpop.eup %1968  ;;  %v1462_v33 = vmul.f32 %v1967_v59, %v1446_v36  ;;  %v1490_v28 = vadd.f32 %v1489_v11, %v1488_v19  ;;  %v3046_v43 = vmul.f32 1.050701, %v1282_v17 }
 0x277   : > { %v1971_v53 = vpop.eup %1970  ;;  %v1499_v46 = vrot.slane %v1498_v24, 2  ;;  %1978 = vpow2.f32 %v1235_v9 }
 0x278   : > { %v1475_v52 = vmul.f32 %v1969_v37, %v1462_v33  ;;  %v1460_v22 = vmul.f32 %v1971_v53, %v1440_v35  ;;  %v1509_v63 = vadd.f32 1.0, %v1490_v28  ;;  %v1521_v34 = vadd.f32 1e-08, %v1490_v28  ;;  %v1973_v0 = vpop.eup %1972 }
 0x279   : > { %v1314_v58 = vmul.f32 %v3046_v43, %v3046_v43  ;;  %v1975_v1 = vpop.eup %1974  ;;  %v1500_v51 = vadd.f32 %v1499_v46, %v1498_v24 }
 0x27a   : > { %v1479_v13 = vmul.f32 %v1475_v52, %v2990_v20  ;;  %v1474_v15 = vmul.f32 %v1973_v0, %v1460_v22  ;;  %1980 = vrcp.f32 %v1509_v63  ;;  %v1464_v32 = vmul.f32 %v1975_v1, %v1452_v10  ;;  %v1977_v61 = vpop.eup %1976 }
 0x27b   : > { %v1491_v44 = vrot.slane %v1314_v58, 4  ;;  %1982 = vrsqrt.f32 %v1521_v34  ;;  %v1501_v35 = vrot.slane %v1500_v51, 1 }
 0x27c   : > { %1483 = vst [vmem:[%s2943_s22 + $0x50] sm:$0xff] %v1479_v13  ;;  %v1478_v26 = vmul.f32 %v1474_v15, %v2992_v25  ;;  %v1476_v36 = vmul.f32 %v1977_v61, %v1464_v32 }
 0x27d   : > { %v1492_v47 = vadd.f32 %v1491_v44, %v1314_v58  ;;  %v1502_v39 = vadd.f32 %v1501_v35, %v1500_v51 }
 0x27e   : > { %1482 = vst [vmem:[%s2943_s22 + $0x48] sm:$0xff] %v1478_v26  ;;  %v1480_v14 = vmul.f32 %v1476_v36, %v3011_v23 }
 0x27f   : > { %v1493_v12 = vrot.slane %v1492_v47, 2  ;;  %v1511_v20 = vadd.f32 1.0, %v1502_v39  ;;  %v1523_v27 = vadd.f32 1e-08, %v1502_v39 }
 0x280   : > { %1484 = vst [vmem:[%s2943_s22 + $0x58] sm:$0xff] %v1480_v14 }
 0x281   : > { %v1494_v50 = vadd.f32 %v1493_v12, %v1492_v47  ;;  %v1979_v57 = vpop.eup %1978  ;;  %1984 = vrcp.f32 %v1511_v20 }
 0x282   : > { %v1728_v40 = vadd.f32 -1.0, %v1979_v57  ;;  %1986 = vrsqrt.f32 %v1523_v27 }
 0x283   : > { %v1495_v38 = vrot.slane %v1494_v50, 1 }
 0x284   : > { %v1981_v60 = vpop.eup %1980  ;;  %v1268_v10 = vmul.f32 1.6732632, %v1728_v40 }
 0x285   : > { %v1514_v25 = vmul.f32 %v1981_v60, %v1490_v28  ;;  %v1496_v5 = vadd.f32 %v1495_v38, %v1494_v50  ;;  %v1983_v48 = vpop.eup %1982 }
 0x286   : > { %v1284_v2 = vsel %vm1204_vm2, %v1188_v21, %v1268_v10 }
 0x287   : > { %v1529_v41 = vmul.f32 %v1983_v48, %v1514_v25  ;;  %v1510_v3 = vadd.f32 1.0, %v1496_v5  ;;  %v1522_v23 = vadd.f32 1e-08, %v1496_v5  ;;  %v1300_v18 = vmul.f32 1.050701, %v1284_v2 }
 0x289   : > { %v1533_v8 = vmul.f32 %v1529_v41, %v3027_v4  ;;  %1988 = vrcp.f32 %v1510_v3  ;;  %v1316_v45 = vmul.f32 %v1300_v18, %v1300_v18 }
 0x28a   : > { %1990 = vrsqrt.f32 %v1522_v23 }
 0x28b   : > { %1537 = vst [vmem:[%s2943_s22 + $0x60] sm:$0xff] %v1533_v8  ;;  %v1985_v29 = vpop.eup %1984  ;;  %v1503_v62 = vrot.slane %v1316_v45, 4 }
 0x28c   : > { %v1518_v7 = vmul.f32 %v1985_v29, %v1502_v39  ;;  %v1987_v6 = vpop.eup %1986 }
 0x28d   : > { %v1504_v49 = vadd.f32 %v1503_v62, %v1316_v45 }
 0x28e   : > { %v1531_v42 = vmul.f32 %v1987_v6, %v1518_v7 }
 0x28f   : > { %v1505_v31 = vrot.slane %v1504_v49, 2 }
 0x290   : > { %v1535_v19 = vmul.f32 %v1531_v42, %v3038_v16 }
 0x291   : > { %v1506_v56 = vadd.f32 %v1505_v31, %v1504_v49 }
 0x292   : > { %1539 = vst [vmem:[%s2943_s22 + $0x70] sm:$0xff] %v1535_v19 }
 0x293   : > { %v1989_v54 = vpop.eup %1988  ;;  %v1507_v11 = vrot.slane %v1506_v56, 1 }
 0x294   : > { %v1516_v4 = vmul.f32 %v1989_v54, %v1496_v5  ;;  %v1991_v30 = vpop.eup %1990 }
 0x295   : > { %v1508_v59 = vadd.f32 %v1507_v11, %v1506_v56 }
 0x296   : > { %v1530_v55 = vmul.f32 %v1991_v30, %v1516_v4 }
 0x297   : > { %v1512_v21 = vadd.f32 1.0, %v1508_v59  ;;  %v1524_v37 = vadd.f32 1e-08, %v1508_v59 }
 0x298   : > { %v1534_v17 = vmul.f32 %v1530_v55, %v3046_v43 }
 0x299   : > { %1992 = vrcp.f32 %v1512_v21 }
 0x29a   : > { %1538 = vst [vmem:[%s2943_s22 + $0x68] sm:$0xff] %v1534_v17  ;;  %1994 = vrsqrt.f32 %v1524_v37 }
 0x2a3   : > { %v1993_v16 = vpop.eup %1992 }
 0x2a4   : > { %v1520_v33 = vmul.f32 %v1993_v16, %v1508_v59  ;;  %v1995_v28 = vpop.eup %1994 }
 0x2a6   : > { %v1532_v24 = vmul.f32 %v1995_v28, %v1520_v33 }
 0x2a8   : > { %v1536_v43 = vmul.f32 %v1532_v24, %v1300_v18 }
 0x2aa   : > { %1540 = vst [vmem:[%s2943_s22 + $0x78] sm:$0xff] %v1536_v43 }
 0x2ab   : > { %2009 = shalt.err (!%p2006_p5)
}
 0x2ac   : > { %s2010_s19 = scalar_lea.hbm %s3067_s12, 2048  ;;  %s2014_s22 = scalar_lea.hbm %s3127_s7, 4096 }
 0x2ad   : > { %p2011_p6 = scmp.ne.s32.totalorder %s3067_s12, %s2010_s19  ;;  %p2015_p10 = scmp.lt.u32.totalorder %s3067_s12, %s3127_s7 }
 0x2ae   : > { %p2016_p11 = scmp.lt.u32.totalorder %s2014_s22, %s2010_s19  ;;  %p2018_p13 = scmp.lt.u32.totalorder %s2010_s19, %s3067_s12 }
 0x2af   : > { %p2012_p7 = pnand %p2011_p6, %p2160_p4 }
 0x2b0   : > { %p2017_p12 = por %p2016_p11, %p2015_p10 }
 0x2b1   : > { %p2013_p9 = pneg %p2012_p7 }
 0x2b2   : > { %p2019_p0 = por %p2018_p13, %p2017_p12 }
 0x2b4   : > { %p2020_p1 = pnand %p2019_p0, %p2013_p9 }
 0x2b6   : > { %2023 = shalt.err (!%p2020_p1)
}
 0x2b7   : > { %s2078_s10 = smov 512   ;;  %s2079_s16 = smov 32  }
 0x2b8   : > { %1738 = dma.vmem_to_hbm [thread:$0]  (%p2160_p4), %s3069_s30, 2048, %s3067_s12, %s3074_s15, %s2078_s10, %s2078_s10, %s2079_s16  }
 0x2b9 PF: > { %p1744_p2 = scmp.ge.s32.totalorder %s2074_s29, 2  ;;  %s1573_s27 = sand.u32 1, %s2054_s24  }
 0x2ba   : > { %s1574_s17 = scalar_lea.sflag [#allocation3], %s1573_s27 }
 0x2bb   : > { %p1741_p3 = pnand %p1744_p2, %p2167_p8 }
 0x2bd   : > { %2049 = dma.done.wait (!%p1741_p3), %s1574_s17, 2048  }
 0x2be   : > { %2051 = vsyncadd (!%p1741_p3), %s1574_s17, 4294965248  ;;  %s20_s29 = sadd.s32 1, %s2074_s29   ;;  %s3130_s24 = smov %s2058_s25 }
 0x2bf   : > { %p17_p5 = scmp.ge.s32.totalorder %s20_s29, 4   ;;  %s3131_s25 = smov %s2062_s26 }
 0x2c0   : > { %s3132_s26 = smov %s2173_s14  ;;  %s3133_s27 = smov %s2070_s28 }
 0x2c1   : > { %s3134_s28 = smov %s3136_s9  ;;  %19 = sbr.rel (!%p17_p5) target bundleno = 4 (0x4), region = 83 }
 0x2c8   :  { %1579 = vsyncpa [#allocation3], 1 }
 0x2c9   :  { %1581 = vsyncpa [#allocation3 + $0x1], 1 }

</bundles_post_ra>
